<compile_context>
chip_gen: v5e
topology: v5e:2x2
jax: 0.10.0
libtpu: 0.0.40
codegen_flags: <defaults>
</compile_context>

<pallas_src>
import math
from functools import lru_cache, partial

import jax
import jax.numpy as jnp
from jax.experimental import pallas as pl
from jax.experimental.pallas import tpu as pltpu


# -----------------------------------------------------------------------------
# Chip-dependent epilogue choice (bf16 VALU exists on v6e/v7x, not on v5e).
# -----------------------------------------------------------------------------
def _detect_bf16_epilogue():
    try:
        kind = jax.devices()[0].device_kind.lower()
    except Exception:
        return False
    return ("v6" in kind) or ("v7" in kind)


_BF16_EPILOGUE = _detect_bf16_epilogue()


# -----------------------------------------------------------------------------
# Pallas kernel: fused concat + 4x [bf16 matmul, bias, ReLU] + lane-dense head.
# -----------------------------------------------------------------------------
def qnet_kernel(ob_ref, a_ref,
                w1a_ref, w1b_ref, w2_ref, w3_ref, w4_ref,
                b_ref, w5_ref, b5_ref,
                o_ref, *, bf16_epilogue):
    ep_dtype = jnp.bfloat16 if bf16_epilogue else jnp.float32
    biases = b_ref[...].astype(ep_dtype)          # (4, 256), cast once per step

    def act(acc_f32, row):
        b = biases[row:row + 1, :]                # (1, 256)
        h = jnp.maximum(acc_f32.astype(ep_dtype) + b, 0)
        return h.astype(jnp.bfloat16)             # back to bf16 for the MXU

    # Layer 1: torch.cat([ob, a], 1) @ W1  ==  ob @ W1a + a @ W1b (fused concat).
    ob = ob_ref[...].astype(jnp.bfloat16)
    a = a_ref[...].astype(jnp.bfloat16)
    acc = (jnp.dot(ob, w1a_ref[...], preferred_element_type=jnp.float32)
           + jnp.dot(a, w1b_ref[...], preferred_element_type=jnp.float32))
    h = act(acc, 0)

    # Layers 2..4.
    for row, w_ref in ((1, w2_ref), (2, w3_ref), (3, w4_ref)):
        acc = jnp.dot(h, w_ref[...], preferred_element_type=jnp.float32)
        h = act(acc, row)

    # Value head: contract w5 (1, 256) with h (tile_b, 256) over features so the
    # batch lands on the lane axis -> (1, tile_b), unmasked lane-dense store.
    # (Any XLU transpose of h this lowering inserts is accepted: ~0.4% of FLOPs.)
    out_row = jax.lax.dot_general(
        w5_ref[...], h,
        dimension_numbers=(((1,), (1,)), ((), ())),
        preferred_element_type=jnp.float32)
    out_row = out_row + b5_ref[...]               # (1,1) bias broadcasts
    o_ref[...] = out_row[None].astype(o_ref.dtype)   # block (1, 1, tile_b)


# -----------------------------------------------------------------------------
# Tiling helpers.
# -----------------------------------------------------------------------------
def _round_up(x, m):
    return ((x + m - 1) // m) * m


def _pick_tile(B, requested):
    """Pick a batch tile: big (amortize per-step overhead) but with >=2 grid
    steps when the batch allows it, so v7x can use both TensorCores."""
    if B <= 128:
        return _round_up(max(B, 1), 8)
    cap = _round_up(B, 128)
    t = min(_round_up(requested, 128), cap)
    if cap // t < 2:
        t = max(128, _round_up(cap // 2, 8))
    return t


# -----------------------------------------------------------------------------
# Build (and cache) the compiled forward for a given static configuration.
# -----------------------------------------------------------------------------
@lru_cache(maxsize=None)
def _build_qnet_forward(B, obs_dim, act_dim, h_size, requested_tile,
                        bf16_epilogue):
    tile_b = _pick_tile(B, requested_tile)
    b_pad = _round_up(B, tile_b)
    grid_b = b_pad // tile_b
    in_dim = obs_dim + act_dim

    kernel = partial(qnet_kernel, bf16_epilogue=bf16_epilogue)

    flops = 2 * b_pad * (in_dim * h_size + 3 * h_size * h_size + h_size)
    bytes_accessed = (b_pad * in_dim * 4                       # ob + a (f32)
                      + 2 * (in_dim * h_size + 3 * h_size * h_size + h_size)
                      + 4 * (4 * h_size + 1)                   # biases (f32)
                      + b_pad * 4)                             # output (f32)

    const = lambda bi: (0, 0)   # weights/biases: single resident block
    call = pl.pallas_call(
        kernel,
        out_shape=jax.ShapeDtypeStruct((grid_b, 1, tile_b), jnp.float32),
        grid_spec=pltpu.PrefetchScalarGridSpec(
            num_scalar_prefetch=0,
            grid=(grid_b,),
            in_specs=[
                pl.BlockSpec((tile_b, obs_dim), lambda bi: (bi, 0)),   # ob
                pl.BlockSpec((tile_b, act_dim), lambda bi: (bi, 0)),   # a
                pl.BlockSpec((obs_dim, h_size), const),                # w1a
                pl.BlockSpec((act_dim, h_size), const),                # w1b
                pl.BlockSpec((h_size, h_size), const),                 # w2
                pl.BlockSpec((h_size, h_size), const),                 # w3
                pl.BlockSpec((h_size, h_size), const),                 # w4
                pl.BlockSpec((4, h_size), const),                      # b1..b4
                pl.BlockSpec((1, h_size), const),                      # w5
                pl.BlockSpec((1, 1), const),                           # b5
            ],
            out_specs=pl.BlockSpec((1, 1, tile_b), lambda bi: (bi, 0, 0)),
        ),
        compiler_params=pltpu.CompilerParams(
            dimension_semantics=("parallel",)),
        cost_estimate=pl.CostEstimate(flops=flops, transcendentals=0,
                                      bytes_accessed=bytes_accessed),
    )

    def fwd(ob, a, w1a, w1b, w2, w3, w4, biases, w5, b5):
        pad = b_pad - B
        if pad:
            ob = jnp.pad(ob, ((0, pad), (0, 0)))
            a = jnp.pad(a, ((0, pad), (0, 0)))
        out = call(ob, a, w1a, w1b, w2, w3, w4, biases, w5, b5)
        return out.reshape(b_pad, 1)[:B]

    return jax.jit(fwd)


def qnet_forward(ob, a, params, *, tile_b=512):
    B, obs_dim = ob.shape
    act_dim = a.shape[1]
    h_size = params["w2"].shape[0]
    fn = _build_qnet_forward(B, obs_dim, act_dim, h_size, int(tile_b),
                             _BF16_EPILOGUE)
    return fn(ob, a,
              params["w1a"], params["w1b"], params["w2"], params["w3"],
              params["w4"], params["biases"], params["w5"], params["b5"])


# -----------------------------------------------------------------------------
# Deterministic parameter init mirroring nn.init.orthogonal_ (relu gain),
# biases = 0. PyTorch Linear(in, out) weight is (out, in); fc1..fc4 are stored
# transposed (in, out) bf16, with fc1 split into the ob / a column groups.
# -----------------------------------------------------------------------------
def orthogonal_(key, out_features, in_features, gain):
    rows, cols = out_features, in_features
    flat = jax.random.normal(key, (rows, cols), dtype=jnp.float32)
    transposed = rows < cols
    if transposed:
        flat = flat.T
    q, r = jnp.linalg.qr(flat)
    d = jnp.sign(jnp.diagonal(r))
    q = q * d[None, :]
    if transposed:
        q = q.T
    return gain * q  # (out, in)


def make_params(key, obs_dim, act_dim, h_size=256):
    gain = math.sqrt(2.0)  # nn.init.calculate_gain('relu')
    keys = jax.random.split(key, 5)
    in_dim = obs_dim + act_dim
    dims = [(in_dim, h_size), (h_size, h_size), (h_size, h_size),
            (h_size, h_size), (h_size, 1)]
    w_pt = [orthogonal_(k, dout, din, gain) for k, (din, dout) in zip(keys, dims)]
    return {
        "w1a": jnp.asarray(w_pt[0][:, :obs_dim].T, jnp.bfloat16),  # (obs, 256)
        "w1b": jnp.asarray(w_pt[0][:, obs_dim:].T, jnp.bfloat16),  # (act, 256)
        "w2": jnp.asarray(w_pt[1].T, jnp.bfloat16),
        "w3": jnp.asarray(w_pt[2].T, jnp.bfloat16),
        "w4": jnp.asarray(w_pt[3].T, jnp.bfloat16),
        "w5": jnp.asarray(w_pt[4], jnp.bfloat16),                  # (1, 256)
        "biases": jnp.zeros((4, h_size), jnp.float32),             # fc1..fc4
        "b5": jnp.zeros((1, 1), jnp.float32),
    }


# -----------------------------------------------------------------------------
# Pure-JAX reference with matching bf16-input / f32-accumulate numerics and the
# same epilogue dtype as the kernel.
# -----------------------------------------------------------------------------
def qnet_ref(ob, a, params, *, bf16_epilogue=_BF16_EPILOGUE):
    ep = jnp.bfloat16 if bf16_epilogue else jnp.float32
    w1 = jnp.concatenate([params["w1a"], params["w1b"]], axis=0)   # (in, 256)
    h = jnp.concatenate([ob, a], axis=1).astype(jnp.bfloat16)
    for i, w in enumerate((w1, params["w2"], params["w3"], params["w4"])):
        acc = jnp.dot(h, w, preferred_element_type=jnp.float32)
        b = params["biases"][i:i + 1, :].astype(ep)
        h = jnp.maximum(acc.astype(ep) + b, 0).astype(jnp.bfloat16)
    out = jnp.dot(h, params["w5"].T,
                  preferred_element_type=jnp.float32) + params["b5"]
    return out  # (B, 1)


if __name__ == "__main__":
    key = jax.random.PRNGKey(0)
    k_param, k_ob, k_a, k_b1, k_b2 = jax.random.split(key, 5)

    obs_dim, act_dim = 24, 8
    batch = 256  # picker chooses tile_b=128 -> 2 grid steps (both v7x TCs busy)

    params = make_params(k_param, obs_dim, act_dim, h_size=256)
    ob = jax.random.normal(k_ob, (batch, obs_dim), dtype=jnp.float32)
    a = jax.random.normal(k_a, (batch, act_dim), dtype=jnp.float32)

    out = jax.block_until_ready(qnet_forward(ob, a, params))
    ref = qnet_ref(ob, a, params)
    assert out.shape == (batch, 1)
    assert jnp.allclose(out, ref, atol=1e-2, rtol=1e-2), "mismatch vs reference"

    # Second run (re-uses the cached compiled forward) with nonzero biases so
    # the packed-bias path is actually exercised numerically.
    params_nz = dict(params)
    params_nz["biases"] = 0.1 * jax.random.normal(k_b1, (4, 256), jnp.float32)
    params_nz["b5"] = 0.1 * jax.random.normal(k_b2, (1, 1), jnp.float32)
    out_nz = jax.block_until_ready(qnet_forward(ob, a, params_nz))
    ref_nz = qnet_ref(ob, a, params_nz)
    assert jnp.allclose(out_nz, ref_nz, atol=1e-2, rtol=1e-2), "bias path mismatch"

    print("KERNEL_OK")
</pallas_src>

<mosaic_0001>
module attributes {stable_mosaic.version = 11 : i64} {
  func.func @qnet_kernel(%arg0: i32, %arg1: memref<128x24xf32, #tpu.memory_space<vmem>>, %arg2: memref<128x8xf32, #tpu.memory_space<vmem>>, %arg3: memref<24x256xbf16, #tpu.memory_space<vmem>>, %arg4: memref<8x256xbf16, #tpu.memory_space<vmem>>, %arg5: memref<256x256xbf16, #tpu.memory_space<vmem>>, %arg6: memref<256x256xbf16, #tpu.memory_space<vmem>>, %arg7: memref<256x256xbf16, #tpu.memory_space<vmem>>, %arg8: memref<4x256xf32, #tpu.memory_space<vmem>>, %arg9: memref<1x256xbf16, #tpu.memory_space<vmem>>, %arg10: memref<1x1xf32, #tpu.memory_space<vmem>>, %arg11: memref<1x1x128xf32, #tpu.memory_space<vmem>>) attributes {dimension_semantics = [#tpu.dimension_semantics<parallel>], iteration_bounds = array<i64: 2>, scalar_prefetch = 0 : i64, scratch_operands = 0 : i64, tpu.core_type = #tpu.core_type<tc>, window_params = [{transform_indices = @transform_0, window_bounds = array<i64: 128, 24>}, {transform_indices = @transform_1, window_bounds = array<i64: 128, 8>}, {pipeline_mode = #tpu.pipeline_mode<synchronous>, transform_indices = @transform_2, window_bounds = array<i64: 24, 256>}, {pipeline_mode = #tpu.pipeline_mode<synchronous>, transform_indices = @transform_3, window_bounds = array<i64: 8, 256>}, {pipeline_mode = #tpu.pipeline_mode<synchronous>, transform_indices = @transform_4, window_bounds = array<i64: 256, 256>}, {pipeline_mode = #tpu.pipeline_mode<synchronous>, transform_indices = @transform_5, window_bounds = array<i64: 256, 256>}, {pipeline_mode = #tpu.pipeline_mode<synchronous>, transform_indices = @transform_6, window_bounds = array<i64: 256, 256>}, {pipeline_mode = #tpu.pipeline_mode<synchronous>, transform_indices = @transform_7, window_bounds = array<i64: 4, 256>}, {pipeline_mode = #tpu.pipeline_mode<synchronous>, transform_indices = @transform_8, window_bounds = array<i64: 1, 256>}, {pipeline_mode = #tpu.pipeline_mode<synchronous>, transform_indices = @transform_9, window_bounds = array<i64: 1, 1>}, {transform_indices = @transform_10, window_bounds = array<i64: 1, 1, 128>}]} {
    %c0 = arith.constant 0 : index
    %c0_0 = arith.constant 0 : index
    %0 = vector.load %arg8[%c0, %c0_0] : memref<4x256xf32, #tpu.memory_space<vmem>>, vector<4x256xf32>
    %c0_1 = arith.constant 0 : index
    %c0_2 = arith.constant 0 : index
    %1 = vector.load %arg1[%c0_1, %c0_2] : memref<128x24xf32, #tpu.memory_space<vmem>>, vector<128x24xf32>
    %2 = arith.truncf %1 : vector<128x24xf32> to vector<128x24xbf16>
    %c0_3 = arith.constant 0 : index
    %c0_4 = arith.constant 0 : index
    %3 = vector.load %arg2[%c0_3, %c0_4] : memref<128x8xf32, #tpu.memory_space<vmem>>, vector<128x8xf32>
    %4 = arith.truncf %3 : vector<128x8xf32> to vector<128x8xbf16>
    %c0_5 = arith.constant 0 : index
    %c0_6 = arith.constant 0 : index
    %5 = vector.load %arg3[%c0_5, %c0_6] : memref<24x256xbf16, #tpu.memory_space<vmem>>, vector<24x256xbf16>
    %cst = arith.constant dense<0.000000e+00> : vector<128x256xf32>
    %6 = tpu.matmul %2, %5, %cst {dimension_numbers = #tpu.dot_dimension_numbers<[1], [0], [0], [1], [0, 0, 1, 1], [], []>} : vector<128x24xbf16>, vector<24x256xbf16>, vector<128x256xf32> -> vector<128x256xf32>
    %c0_7 = arith.constant 0 : index
    %c0_8 = arith.constant 0 : index
    %7 = vector.load %arg4[%c0_7, %c0_8] : memref<8x256xbf16, #tpu.memory_space<vmem>>, vector<8x256xbf16>
    %cst_9 = arith.constant dense<0.000000e+00> : vector<128x256xf32>
    %8 = tpu.matmul %4, %7, %cst_9 {dimension_numbers = #tpu.dot_dimension_numbers<[1], [0], [0], [1], [0, 0, 1, 1], [], []>} : vector<128x8xbf16>, vector<8x256xbf16>, vector<128x256xf32> -> vector<128x256xf32>
    %9 = arith.addf %6, %8 : vector<128x256xf32>
    %10 = vector.extract_strided_slice %0 {offsets = [0, 0], sizes = [1, 256], strides = [1, 1]} : vector<4x256xf32> to vector<1x256xf32>
    %11 = vector.broadcast %10 : vector<1x256xf32> to vector<128x256xf32>
    %12 = arith.addf %9, %11 : vector<128x256xf32>
    %cst_10 = arith.constant 0.000000e+00 : f32
    %13 = vector.broadcast %cst_10 : f32 to vector<128x256xf32>
    %14 = arith.maximumf %12, %13 : vector<128x256xf32>
    %15 = arith.truncf %14 : vector<128x256xf32> to vector<128x256xbf16>
    %c0_11 = arith.constant 0 : index
    %c0_12 = arith.constant 0 : index
    %16 = vector.load %arg5[%c0_11, %c0_12] : memref<256x256xbf16, #tpu.memory_space<vmem>>, vector<256x256xbf16>
    %cst_13 = arith.constant dense<0.000000e+00> : vector<128x256xf32>
    %17 = tpu.matmul %15, %16, %cst_13 {dimension_numbers = #tpu.dot_dimension_numbers<[1], [0], [0], [1], [0, 0, 1, 1], [], []>} : vector<128x256xbf16>, vector<256x256xbf16>, vector<128x256xf32> -> vector<128x256xf32>
    %18 = vector.extract_strided_slice %0 {offsets = [1, 0], sizes = [1, 256], strides = [1, 1]} : vector<4x256xf32> to vector<1x256xf32>
    %19 = vector.broadcast %18 : vector<1x256xf32> to vector<128x256xf32>
    %20 = arith.addf %17, %19 : vector<128x256xf32>
    %cst_14 = arith.constant 0.000000e+00 : f32
    %21 = vector.broadcast %cst_14 : f32 to vector<128x256xf32>
    %22 = arith.maximumf %20, %21 : vector<128x256xf32>
    %23 = arith.truncf %22 : vector<128x256xf32> to vector<128x256xbf16>
    %c0_15 = arith.constant 0 : index
    %c0_16 = arith.constant 0 : index
    %24 = vector.load %arg6[%c0_15, %c0_16] : memref<256x256xbf16, #tpu.memory_space<vmem>>, vector<256x256xbf16>
    %cst_17 = arith.constant dense<0.000000e+00> : vector<128x256xf32>
    %25 = tpu.matmul %23, %24, %cst_17 {dimension_numbers = #tpu.dot_dimension_numbers<[1], [0], [0], [1], [0, 0, 1, 1], [], []>} : vector<128x256xbf16>, vector<256x256xbf16>, vector<128x256xf32> -> vector<128x256xf32>
    %26 = vector.extract_strided_slice %0 {offsets = [2, 0], sizes = [1, 256], strides = [1, 1]} : vector<4x256xf32> to vector<1x256xf32>
    %27 = vector.broadcast %26 : vector<1x256xf32> to vector<128x256xf32>
    %28 = arith.addf %25, %27 : vector<128x256xf32>
    %cst_18 = arith.constant 0.000000e+00 : f32
    %29 = vector.broadcast %cst_18 : f32 to vector<128x256xf32>
    %30 = arith.maximumf %28, %29 : vector<128x256xf32>
    %31 = arith.truncf %30 : vector<128x256xf32> to vector<128x256xbf16>
    %c0_19 = arith.constant 0 : index
    %c0_20 = arith.constant 0 : index
    %32 = vector.load %arg7[%c0_19, %c0_20] : memref<256x256xbf16, #tpu.memory_space<vmem>>, vector<256x256xbf16>
    %cst_21 = arith.constant dense<0.000000e+00> : vector<128x256xf32>
    %33 = tpu.matmul %31, %32, %cst_21 {dimension_numbers = #tpu.dot_dimension_numbers<[1], [0], [0], [1], [0, 0, 1, 1], [], []>} : vector<128x256xbf16>, vector<256x256xbf16>, vector<128x256xf32> -> vector<128x256xf32>
    %34 = vector.extract_strided_slice %0 {offsets = [3, 0], sizes = [1, 256], strides = [1, 1]} : vector<4x256xf32> to vector<1x256xf32>
    %35 = vector.broadcast %34 : vector<1x256xf32> to vector<128x256xf32>
    %36 = arith.addf %33, %35 : vector<128x256xf32>
    %cst_22 = arith.constant 0.000000e+00 : f32
    %37 = vector.broadcast %cst_22 : f32 to vector<128x256xf32>
    %38 = arith.maximumf %36, %37 : vector<128x256xf32>
    %39 = arith.truncf %38 : vector<128x256xf32> to vector<128x256xbf16>
    %c0_23 = arith.constant 0 : index
    %c0_24 = arith.constant 0 : index
    %40 = vector.load %arg9[%c0_23, %c0_24] : memref<1x256xbf16, #tpu.memory_space<vmem>>, vector<1x256xbf16>
    %cst_25 = arith.constant dense<0.000000e+00> : vector<1x128xf32>
    %41 = tpu.matmul %40, %39, %cst_25 {dimension_numbers = #tpu.dot_dimension_numbers<[1], [1], [0], [0], [0, 0, 1, 0], [], []>} : vector<1x256xbf16>, vector<128x256xbf16>, vector<1x128xf32> -> vector<1x128xf32>
    %c0_26 = arith.constant 0 : index
    %c0_27 = arith.constant 0 : index
    %42 = vector.load %arg10[%c0_26, %c0_27] : memref<1x1xf32, #tpu.memory_space<vmem>>, vector<1x1xf32>
    %43 = vector.broadcast %42 : vector<1x1xf32> to vector<1x128xf32>
    %44 = arith.addf %41, %43 : vector<1x128xf32>
    %45 = vector.shape_cast %44 : vector<1x128xf32> to vector<1x1x128xf32>
    %c0_28 = arith.constant 0 : index
    %c0_29 = arith.constant 0 : index
    %c0_30 = arith.constant 0 : index
    %46 = vector.load %arg11[%c0_28, %c0_29, %c0_30] : memref<1x1x128xf32, #tpu.memory_space<vmem>>, vector<1x1x128xf32>
    tpu.vector_store %arg11[%c0_28, %c0_29, %c0_30], %45 {strides = array<i32>} : memref<1x1x128xf32, #tpu.memory_space<vmem>>, vector<1x1x128xf32>,
    return
  }
  func.func @transform_0(%arg0: i32) -> (i32, i32) {
    %c0_i32 = arith.constant 0 : i32
    %c0_i32_0 = arith.constant 0 : i32
    return %arg0, %c0_i32 : i32, i32
  }
  func.func @transform_1(%arg0: i32) -> (i32, i32) {
    %c0_i32 = arith.constant 0 : i32
    %c0_i32_0 = arith.constant 0 : i32
    return %arg0, %c0_i32 : i32, i32
  }
  func.func @transform_2(%arg0: i32) -> (i32, i32) {
    %c0_i32 = arith.constant 0 : i32
    %c0_i32_0 = arith.constant 0 : i32
    %c0_i32_1 = arith.constant 0 : i32
    return %c0_i32, %c0_i32_0 : i32, i32
  }
  func.func @transform_3(%arg0: i32) -> (i32, i32) {
    %c0_i32 = arith.constant 0 : i32
    %c0_i32_0 = arith.constant 0 : i32
    %c0_i32_1 = arith.constant 0 : i32
    return %c0_i32, %c0_i32_0 : i32, i32
  }
  func.func @transform_4(%arg0: i32) -> (i32, i32) {
    %c0_i32 = arith.constant 0 : i32
    %c0_i32_0 = arith.constant 0 : i32
    %c0_i32_1 = arith.constant 0 : i32
    return %c0_i32, %c0_i32_0 : i32, i32
  }
  func.func @transform_5(%arg0: i32) -> (i32, i32) {
    %c0_i32 = arith.constant 0 : i32
    %c0_i32_0 = arith.constant 0 : i32
    %c0_i32_1 = arith.constant 0 : i32
    return %c0_i32, %c0_i32_0 : i32, i32
  }
  func.func @transform_6(%arg0: i32) -> (i32, i32) {
    %c0_i32 = arith.constant 0 : i32
    %c0_i32_0 = arith.constant 0 : i32
    %c0_i32_1 = arith.constant 0 : i32
    return %c0_i32, %c0_i32_0 : i32, i32
  }
  func.func @transform_7(%arg0: i32) -> (i32, i32) {
    %c0_i32 = arith.constant 0 : i32
    %c0_i32_0 = arith.constant 0 : i32
    %c0_i32_1 = arith.constant 0 : i32
    return %c0_i32, %c0_i32_0 : i32, i32
  }
  func.func @transform_8(%arg0: i32) -> (i32, i32) {
    %c0_i32 = arith.constant 0 : i32
    %c0_i32_0 = arith.constant 0 : i32
    %c0_i32_1 = arith.constant 0 : i32
    return %c0_i32, %c0_i32_0 : i32, i32
  }
  func.func @transform_9(%arg0: i32) -> (i32, i32) {
    %c0_i32 = arith.constant 0 : i32
    %c0_i32_0 = arith.constant 0 : i32
    %c0_i32_1 = arith.constant 0 : i32
    return %c0_i32, %c0_i32_0 : i32, i32
  }
  func.func @transform_10(%arg0: i32) -> (i32, i32, i32) {
    %c0_i32 = arith.constant 0 : i32
    %c0_i32_0 = arith.constant 0 : i32
    %c0_i32_1 = arith.constant 0 : i32
    return %arg0, %c0_i32, %c0_i32_0 : i32, i32, i32
  }
}

</mosaic_0001>

<bundles_post_ra>
// kernel: fwd.1
= control target key start
LH: loop header
LB: loop body
LE: loop exit
PB: predicated region body
PF: predicated region fallthrough
CT: control target
= control target key end

     0   :  { %s3790_s0 = inlined_call_operand.vmem [shape: f32[256,24], index: 0, kind: input, shape index: {}]   ;;  %s3791_s1 = inlined_call_operand.vmem [shape: f32[256,8], index: 1, kind: input, shape index: {}]   ;;  %s3792_s2 = inlined_call_operand.vmem [shape: bf16[24,256], index: 2, kind: input, shape index: {}]   ;;  %s3793_s3 = inlined_call_operand.vmem [shape: bf16[8,256], index: 3, kind: input, shape index: {}]   ;;  %s3794_s4 = inlined_call_operand.vmem [shape: bf16[256,256], index: 4, kind: input, shape index: {}]   ;;  %s3795_s5 = inlined_call_operand.vmem [shape: bf16[256,256], index: 5, kind: input, shape index: {}]   ;;  %s3796_s6 = inlined_call_operand.hbm [shape: bf16[256,256], index: 6, kind: input, shape index: {}]   ;;  %s3797_s7 = inlined_call_operand.vmem [shape: f32[4,256], index: 7, kind: input, shape index: {}]   ;;  %s3798_s8 = inlined_call_operand.vmem [shape: bf16[1,256], index: 8, kind: input, shape index: {}]   ;;  %s3799_s9 = inlined_call_operand.<no memory space> [shape: f32[1,1], index: 9, kind: input, shape index: {}]   ;;  %s3800_s10 = inlined_call_operand.hbm [shape: f32[2,1,128], index: 10, kind: output, shape index: {}]  }
   0x1   :  { %v15_v0 = vstv %s3799_s9 }
   0x2   :  { %16 = vst [vmem:[#allocation2] sm:$0x1] %v15_v0 }
   0x3   :  { %17 = vsyncpa [#allocation4], 0 }
   0x4   :  { %18 = vsyncpa [#allocation5], 0 }
   0x5   :  { %20 = vsyncpa [#allocation5 + $0x1], 0  ;;  %s3028_s15 = smov 0   ;;  %s3030_s16 = smov 0  }
   0x6   :  { %s3032_s17 = smov 0   ;;  %s3034_s18 = smov 0  }
   0x7 LB: > { %s3049_s9 = sadd.s32 4294967295, %s2964_s18   ;;  %s2279_s19 = sadd.s32 4294967294, %s2964_s18   ;;  %s2964_s18 = sphi %s3034_s18, %s3806_s18   ;;  %s2960_s17 = sphi %s3032_s17, %s3805_s17   ;;  %s2956_s16 = sphi %s3030_s16, %s3804_s16   ;;  %s2952_s15 = sphi %s3028_s15, %s3803_s15  }
   0x8   : > { %s3053_s20 = sadd.s32 1, %s2964_s18   ;;  %s253_s21 = sadd.s32 1, %s2960_s17 }
   0x9   : > { %s250_s22 = ssub.s32 %s2964_s18, %s3053_s20  ;;  %p263_p0 = scmp.ne.s32.totalorder %s2960_s17, %s2956_s16 }
   0xa   : > { %p251_p1 = scmp.eq.s32.totalorder %s250_s22, 0  ;;  %p264_p2 = scmp.eq.s32.totalorder %s3049_s9, 1 }
   0xb   : > { %p269_p3 = scmp.ne.s32.totalorder %s2956_s16, %s2952_s15  ;;  %p270_p4 = scmp.eq.s32.totalorder %s2279_s19, 1 }
   0xc   : > { %s3064_s23 = scalar_select %p251_p1, %s2960_s17, %s253_s21  }
   0xd   : > { %p3066_p5 = por %p264_p2, %p263_p0  ;;  %p3070_p6 = por %p270_p4, %p269_p3 }
   0xe   : > { %p2280_p7 = scmp.ge.s32.totalorder %s2964_s18, 1  ;;  %p277_p8 = scmp.lt.s32.totalorder %s2964_s18, 3 }
   0xf   : > { %p2827_p9 = scmp.eq.s32.totalorder %s3049_s9, 0  ;;  %s300_s28 = sshll.u32 %s3796_s6, 4  ;;  %s301_s28 = int_to_ptr.hbm [resolvable:$true] %s300_s28 }
  0x10   : > { %p278_p10 = pnand %p2280_p7, %p277_p8  ;;  %s2966_s29 = smov [#allocation3]  }
  0x11   : > { %s302_s30 = sshll.u32 %s2966_s29, 4  ;;  %s2967_s11 = smov 128   ;;  %s303_s30 = int_to_ptr.vmem [resolvable:$true] %s302_s30 }
  0x12   : > { %p2819_p11 = pneg %p278_p10  ;;  %s2968_s12 = smov 8  }
  0x13   : > { %345 = sbr.rel (%p278_p10) target bundleno = 935 (0x3a7), region = 60 }
  0x14   : > { %p2820_p12 = pnand %p2827_p9, %p2819_p11 }
  0x16   : > { %2822 = dma.hbm_to_vmem [thread:$0]  (!%p2820_p12), %s301_s28, 4096, %s303_s30, [#allocation4], %s2967_s11, %s2967_s11, %s2968_s12  }
  0x18   : > { %2943 = dma.done.wait (%p2827_p9), [#allocation4], 4096  }
  0x19   : > { %2945 = vsyncadd (%p2827_p9), [#allocation4], 4294963200  ;;  %s2285_s13 = sshll.u32 %s3049_s9, 4  ;;  %v452_v1 = vld [vmem:[%s3792_s2 + $0x10] sm:$0xff]  ;;  %v453_v2 = vld [vmem:[%s3793_s3] sm:$0xff]  ;;  %vm484_vm0 = vcmask 1043456   ;;  %s2196_s19 = scalar_lea.hbm %s3800_s10, %s3049_s9 }
  0x1a   : > { %p389_p13 = scmp.lt.s32.totalorder %s2285_s13, 31  ;;  %v596_v3 = vunpack.c.l.b16 %v452_v1  ;;  %v597_v4 = vunpack.c.h.b16 %v452_v1  ;;  %v455_v5 = vunpack.c.l.b16 %v453_v2  ;;  %v456_v6 = vunpack.c.h.b16 %v453_v2  ;;  %v2307_v7 = vld [vmem:[%s3792_s2] sm:$0xf]  ;;  %v2716_v12 = vld [vmem:[%s3792_s2 + $0x4] sm:$0xf0]  ;;  %s386_s12 = sand.u32 1, %s2956_s16  }
  0x1b   : > { %v2715_v13 = vld [vmem:[%s3792_s2 + $0x4] sm:$0xf]  ;;  %v2309_v14 = vld [vmem:[%s3792_s2 + $0x8] sm:$0xf0]  ;;  %v2308_v21 = vor.u32 %v2716_v12, %v2307_v7  ;;  %vm459_vm1 = vcmask 64512   ;;  %vm604_vm2 = vcmask 195584  }
  0x1c   : > { %s3808_s13 = smov (!%p389_p13, %s2285_s13), 31  ;;  %v600_v8 = vpack.c.b16 %v596_v3, %v596_v3  ;;  %v601_v9 = vpack.c.b16 %v597_v4, %v597_v4  ;;  %v457_v10 = vpack.c.b16 %v455_v5, %v455_v5  ;;  %v458_v11 = vpack.c.b16 %v456_v6, %v456_v6  ;;  %v2731_v45 = vld [vmem:[%s3794_s4 + $0x74] sm:$0xf]  ;;  %v2389_v46 = vld [vmem:[%s3794_s4 + $0x78] sm:$0xf0]  ;;  %s387_s21 = scalar_lea.vmem [#allocation6], %s386_s12 }
  0x1d   : > { %s2286_s14 = sshll.u32 %s3808_s13, 3  ;;  %v2312_v22 = vor.u32 %v2715_v13, %v2309_v14  ;;  %v2747_v47 = vld [vmem:[%s3794_s4 + $0xf4] sm:$0xf]  ;;  %v2392_v48 = vor.u32 %v2731_v45, %v2389_v46  ;;  %v2453_v49 = vld [vmem:[%s3794_s4 + $0xf8] sm:$0xf0]  ;;  %s2198_s22 = sshll.u32 %s387_s21, 4  ;;  %s2199_s22 = int_to_ptr.vmem [resolvable:$true] %s2198_s22 }
  0x1e   : > { %s3096_s29 = scalar_lea.vmem %s3791_s1, %s2286_s14  ;;  %s3113_s30 = scalar_lea.vmem %s3790_s0, %s2286_s14  ;;  %v630_v17 = vsel %vm484_vm0, %v600_v8, 0  ;;  %v633_v18 = vsel %vm484_vm0, %v601_v9, 0  ;;  %v486_v19 = vsel %vm484_vm0, %v457_v10, 0  ;;  %v489_v20 = vsel %vm484_vm0, %v458_v11, 0  ;;  %v2387_v50 = vld [vmem:[%s3794_s4 + $0x70] sm:$0xf] }
  0x1f   : > { %v426_v15 = vld [vmem:[%s3096_s29] sm:$0xff]  ;;  %v427_v16 = vld [vmem:[%s3096_s29 + $0x8] sm:$0xff]  ;;  %641 = vmatpush.bf16.msra.mxu2 %v630_v17  ;;  %690 = vmatpush.bf16.msra.mxu3 %v633_v18  ;;  %v428_v27 = vld [vmem:[%s3096_s29 + $0x10] sm:$0xff]  ;;  %v2456_v52 = vor.u32 %v2747_v47, %v2453_v49  ;;  %s2188_s26 = scalar_lea.sflag [#allocation5], %s386_s12  ;;  %s2918_s11 = scalar_lea.hbm %s3800_s10, 2 }
  0x20   : > { %v402_v23 = vld [vmem:[%s3113_s30] sm:$0xff]  ;;  %v403_v24 = vld [vmem:[%s3113_s30 + $0x8] sm:$0xff]  ;;  %498 = vmatpush.bf16.msra.mxu0 %v486_v19  ;;  %547 = vmatpush.bf16.msra.mxu1 %v489_v20  ;;  %v442_v25 = vpack.c.bf16 %v427_v16, %v426_v15  ;;  %v429_v28 = vld [vmem:[%s3096_s29 + $0x18] sm:$0xff] }
  0x21   : > { %v418_v26 = vpack.c.bf16 %v403_v24, %v402_v23  ;;  %v404_v29 = vld [vmem:[%s3113_s30 + $0x10] sm:$0xff]  ;;  %v405_v30 = vld [vmem:[%s3113_s30 + $0x18] sm:$0xff]  ;;  %v443_v31 = vpack.c.bf16 %v429_v28, %v428_v27  ;;  %v430_v33 = vld [vmem:[%s3096_s29 + $0x20] sm:$0xff] }
  0x22   : > { %v419_v32 = vpack.c.bf16 %v405_v30, %v404_v29  ;;  %v431_v34 = vld [vmem:[%s3096_s29 + $0x28] sm:$0xff]  ;;  %v406_v35 = vld [vmem:[%s3113_s30 + $0x20] sm:$0xff]  ;;  %v432_v39 = vld [vmem:[%s3096_s29 + $0x30] sm:$0xff] }
  0x23   : > { %642 = vmatpush.bf16.msra.mxu2 %v2308_v21  ;;  %691 = vmatpush.bf16.msra.mxu3 %v2312_v22  ;;  %v407_v36 = vld [vmem:[%s3113_s30 + $0x28] sm:$0xff]  ;;  %v444_v37 = vpack.c.bf16 %v431_v34, %v430_v33  ;;  %v433_v40 = vld [vmem:[%s3096_s29 + $0x38] sm:$0xff]  ;;  %v408_v41 = vld [vmem:[%s3113_s30 + $0x30] sm:$0xff] }
  0x24   : > { %2289 = vmatmul.msk.bf16.vlgmr.msra.gmra.mxu0 %vm459_vm1, %v442_v25  ;;  %2297 = vmatmul.msk.bf16.vlgmr.msra.gmra.mxu1 %vm459_vm1, %v442_v25  ;;  %v420_v38 = vpack.c.bf16 %v407_v36, %v406_v35  ;;  %v409_v42 = vld [vmem:[%s3113_s30 + $0x38] sm:$0xff]  ;;  %v445_v43 = vpack.c.bf16 %v433_v40, %v432_v39  ;;  %v2451_v54 = vld [vmem:[%s3794_s4 + $0xf0] sm:$0xf]  ;;  %v434_v57 = vld [vmem:[%s3096_s29 + $0x40] sm:$0xff] }
  0x25   : > { %v421_v44 = vpack.c.bf16 %v409_v42, %v408_v41  ;;  %v2732_v51 = vld [vmem:[%s3794_s4 + $0x74] sm:$0xf0]  ;;  %v435_v58 = vld [vmem:[%s3096_s29 + $0x48] sm:$0xff]  ;;  %v410_v59 = vld [vmem:[%s3113_s30 + $0x40] sm:$0xff] }
  0x26   : > { %2313 = vmatmul.msk.bf16.vlgmr.msra.gmra.mxu2 %vm604_vm2, %v418_v26  ;;  %2321 = vmatmul.msk.bf16.vlgmr.msra.gmra.mxu3 %vm604_vm2, %v418_v26  ;;  %v2388_v53 = vor.u32 %v2732_v51, %v2387_v50  ;;  %v2748_v55 = vld [vmem:[%s3794_s4 + $0xf4] sm:$0xf0]  ;;  %v411_v60 = vld [vmem:[%s3113_s30 + $0x48] sm:$0xff]  ;;  %v446_v61 = vpack.c.bf16 %v435_v58, %v434_v57  ;;  %v2729_v63 = vld [vmem:[%s3794_s4 + $0x64] sm:$0xf] }
  0x27   : > { %1116 = vmatpush.bf16.msrb.mxu2 %v2392_v48  ;;  %v2452_v56 = vor.u32 %v2748_v55, %v2451_v54  ;;  %1165 = vmatpush.bf16.msrb.mxu3 %v2456_v52  ;;  %v422_v62 = vpack.c.bf16 %v411_v60, %v410_v59  ;;  %v2381_v0 = vld [vmem:[%s3794_s4 + $0x68] sm:$0xf0]  ;;  %v2745_v1 = vld [vmem:[%s3794_s4 + $0xe4] sm:$0xf]  ;;  %v2379_v4 = vld [vmem:[%s3794_s4 + $0x60] sm:$0xf] }
  0x28   : > { %1018 = vmatpush.bf16.msrb.mxu0 %v2388_v53  ;;  %v2384_v2 = vor.u32 %v2729_v63, %v2381_v0  ;;  %v2445_v3 = vld [vmem:[%s3794_s4 + $0xe8] sm:$0xf0]  ;;  %v2730_v5 = vld [vmem:[%s3794_s4 + $0x64] sm:$0xf0]  ;;  %v2443_v8 = vld [vmem:[%s3794_s4 + $0xe0] sm:$0xf] }
  0x29   : > { %1067 = vmatpush.bf16.msrb.mxu1 %v2452_v56  ;;  %v2448_v6 = vor.u32 %v2745_v1, %v2445_v3  ;;  %v2380_v7 = vor.u32 %v2730_v5, %v2379_v4  ;;  %v2746_v9 = vld [vmem:[%s3794_s4 + $0xe4] sm:$0xf0]  ;;  %v436_v11 = vld [vmem:[%s3096_s29 + $0x50] sm:$0xff]  ;;  %v437_v12 = vld [vmem:[%s3096_s29 + $0x58] sm:$0xff] }
  0x2a   : > { %v2444_v10 = vor.u32 %v2746_v9, %v2443_v8  ;;  %v412_v13 = vld [vmem:[%s3113_s30 + $0x50] sm:$0xff]  ;;  %v413_v14 = vld [vmem:[%s3113_s30 + $0x58] sm:$0xff]  ;;  %v447_v15 = vpack.c.bf16 %v437_v12, %v436_v11  ;;  %v438_v26 = vld [vmem:[%s3096_s29 + $0x60] sm:$0xff] }
  0x2b   : > { %1117 = vmatpush.bf16.msrb.mxu2 %v2384_v2  ;;  %1166 = vmatpush.bf16.msrb.mxu3 %v2448_v6  ;;  %v423_v16 = vpack.c.bf16 %v413_v14, %v412_v13  ;;  %v2727_v17 = vld [vmem:[%s3794_s4 + $0x54] sm:$0xf]  ;;  %v2373_v18 = vld [vmem:[%s3794_s4 + $0x58] sm:$0xf0]  ;;  %v2371_v22 = vld [vmem:[%s3794_s4 + $0x50] sm:$0xf] }
  0x2c   : > { %1019 = vmatpush.bf16.msrb.mxu0 %v2380_v7  ;;  %v2743_v19 = vld [vmem:[%s3794_s4 + $0xd4] sm:$0xf]  ;;  %v2376_v20 = vor.u32 %v2727_v17, %v2373_v18  ;;  %v2437_v21 = vld [vmem:[%s3794_s4 + $0xd8] sm:$0xf0]  ;;  %v2728_v23 = vld [vmem:[%s3794_s4 + $0x54] sm:$0xf0] }
  0x2d   : > { %1068 = vmatpush.bf16.msrb.mxu1 %v2444_v10  ;;  %v2440_v24 = vor.u32 %v2743_v19, %v2437_v21  ;;  %v2372_v25 = vor.u32 %v2728_v23, %v2371_v22  ;;  %v439_v27 = vld [vmem:[%s3096_s29 + $0x68] sm:$0xff]  ;;  %v414_v28 = vld [vmem:[%s3113_s30 + $0x60] sm:$0xff]  ;;  %v2355_v47 = vld [vmem:[%s3794_s4 + $0x30] sm:$0xf] }
  0x2e   : > { %v415_v29 = vld [vmem:[%s3113_s30 + $0x68] sm:$0xff]  ;;  %v448_v30 = vpack.c.bf16 %v439_v27, %v438_v26  ;;  %v2363_v34 = vld [vmem:[%s3794_s4 + $0x40] sm:$0xf]  ;;  %v2725_v40 = vld [vmem:[%s3794_s4 + $0x44] sm:$0xf] }
  0x2f   : > { %1118 = vmatpush.bf16.msrb.mxu2 %v2376_v20  ;;  %1167 = vmatpush.bf16.msrb.mxu3 %v2440_v24  ;;  %v2726_v35 = vld [vmem:[%s3794_s4 + $0x44] sm:$0xf0]  ;;  %v2427_v36 = vld [vmem:[%s3794_s4 + $0xc0] sm:$0xf]  ;;  %v2365_v41 = vld [vmem:[%s3794_s4 + $0x48] sm:$0xf0] }
  0x30   : > { %1020 = vmatpush.bf16.msrb.mxu0 %v2372_v25  ;;  %v2742_v39 = vld [vmem:[%s3794_s4 + $0xc4] sm:$0xf0]  ;;  %v2429_v45 = vld [vmem:[%s3794_s4 + $0xc8] sm:$0xf0]  ;;  %v2724_v48 = vld [vmem:[%s3794_s4 + $0x34] sm:$0xf0] }
  0x31   : > { %v2428_v42 = vor.u32 %v2742_v39, %v2427_v36  ;;  %v2419_v49 = vld [vmem:[%s3794_s4 + $0xb0] sm:$0xf]  ;;  %v2356_v50 = vor.u32 %v2724_v48, %v2355_v47  ;;  %v2740_v51 = vld [vmem:[%s3794_s4 + $0xb4] sm:$0xf0]  ;;  %v2723_v52 = vld [vmem:[%s3794_s4 + $0x34] sm:$0xf] }
  0x32   : > { %v2420_v53 = vor.u32 %v2740_v51, %v2419_v49  ;;  %v2357_v54 = vld [vmem:[%s3794_s4 + $0x38] sm:$0xf0]  ;;  %v2739_v55 = vld [vmem:[%s3794_s4 + $0xb4] sm:$0xf]  ;;  %v2347_v63 = vld [vmem:[%s3794_s4 + $0x20] sm:$0xf] }
  0x33   : > { %v440_v56 = vld [vmem:[%s3096_s29 + $0x70] sm:$0xff]  ;;  %v441_v57 = vld [vmem:[%s3096_s29 + $0x78] sm:$0xff]  ;;  %v2360_v58 = vor.u32 %v2723_v52, %v2357_v54  ;;  %v2722_v0 = vld [vmem:[%s3794_s4 + $0x24] sm:$0xf0] }
  0x34   : > { %2290 = vmatmul.msk.bf16.gmra.mxu0 %vm459_vm1, %v443_v31  ;;  %2298 = vmatmul.msk.bf16.gmra.mxu1 %vm459_vm1, %v443_v31  ;;  %v2435_v31 = vld [vmem:[%s3794_s4 + $0xd0] sm:$0xf]  ;;  %v2421_v59 = vld [vmem:[%s3794_s4 + $0xb8] sm:$0xf0]  ;;  %v2348_v1 = vor.u32 %v2722_v0, %v2347_v63  ;;  %v2411_v2 = vld [vmem:[%s3794_s4 + $0xa0] sm:$0xf]  ;;  %v449_v9 = vpack.c.bf16 %v441_v57, %v440_v56 }
  0x35   : > { %v416_v60 = vld [vmem:[%s3113_s30 + $0x70] sm:$0xff]  ;;  %v2738_v3 = vld [vmem:[%s3794_s4 + $0xa4] sm:$0xf0]  ;;  %v2721_v4 = vld [vmem:[%s3794_s4 + $0x24] sm:$0xf] }
  0x36   : > { %2314 = vmatmul.msk.bf16.gmra.mxu2 %vm604_vm2, %v419_v32  ;;  %2322 = vmatmul.msk.bf16.gmra.mxu3 %vm604_vm2, %v419_v32  ;;  %v2744_v32 = vld [vmem:[%s3794_s4 + $0xd4] sm:$0xf0]  ;;  %v2412_v5 = vor.u32 %v2738_v3, %v2411_v2  ;;  %v2349_v6 = vld [vmem:[%s3794_s4 + $0x28] sm:$0xf0]  ;;  %v2737_v7 = vld [vmem:[%s3794_s4 + $0xa4] sm:$0xf] }
  0x37   : > { %v2436_v33 = vor.u32 %v2744_v32, %v2435_v31  ;;  %v2413_v8 = vld [vmem:[%s3794_s4 + $0xa8] sm:$0xf0]  ;;  %v2352_v10 = vor.u32 %v2721_v4, %v2349_v6  ;;  %v2339_v12 = vld [vmem:[%s3794_s4 + $0x10] sm:$0xf]  ;;  %v2720_v13 = vld [vmem:[%s3794_s4 + $0x14] sm:$0xf0] }
  0x38   : > { %v2416_v11 = vor.u32 %v2737_v7, %v2413_v8  ;;  %v2403_v14 = vld [vmem:[%s3794_s4 + $0x90] sm:$0xf]  ;;  %v2736_v17 = vld [vmem:[%s3794_s4 + $0x94] sm:$0xf0]  ;;  %v2719_v18 = vld [vmem:[%s3794_s4 + $0x14] sm:$0xf] }
  0x39   : > { %1069 = vmatpush.bf16.msrb.mxu1 %v2436_v33  ;;  %v2341_v19 = vld [vmem:[%s3794_s4 + $0x18] sm:$0xf0]  ;;  %v2404_v20 = vor.u32 %v2736_v17, %v2403_v14  ;;  %v2735_v22 = vld [vmem:[%s3794_s4 + $0x94] sm:$0xf]  ;;  %v2331_v25 = vld [vmem:[%s3794_s4] sm:$0xf] }
  0x3a   : > { %v2344_v21 = vor.u32 %v2719_v18, %v2341_v19  ;;  %v2405_v23 = vld [vmem:[%s3794_s4 + $0x98] sm:$0xf0]  ;;  %v2718_v26 = vld [vmem:[%s3794_s4 + $0x4] sm:$0xf0]  ;;  %v2395_v27 = vld [vmem:[%s3794_s4 + $0x80] sm:$0xf] }
  0x3b   : > { %v2408_v24 = vor.u32 %v2735_v22, %v2405_v23  ;;  %v2333_v31 = vld [vmem:[%s3794_s4 + $0x8] sm:$0xf0]  ;;  %v3374_v39 = vld [vmem:[%s3797_s7] sm:$0xff] }
  0x3d   : > { %1070 = vmatpush.bf16.msrb.mxu1 %v2428_v42  ;;  %v734_v42 = vperm.slane %v3374_v39, 0 }
  0x3f   : > { %v3378_v47 = vperm.slane %v734_v42, 0 }
  0x41   : > { %1071 = vmatpush.bf16.msrb.mxu1 %v2420_v53 }
  0x44   : > { %2291 = vmatmul.msk.bf16.gmra.mxu0 %vm459_vm1, %v444_v37  ;;  %2299 = vmatmul.msk.bf16.gmra.mxu1 %vm459_vm1, %v444_v37  ;;  %v424_v37 = vpack.c.bf16 %v415_v29, %v414_v28  ;;  %v2332_v28 = vor.u32 %v2718_v26, %v2331_v25  ;;  %v2734_v29 = vld [vmem:[%s3794_s4 + $0x84] sm:$0xf0] }
  0x45   : > { %1072 = vmatpush.bf16.msrb.mxu1 %v2412_v5  ;;  %v2396_v32 = vor.u32 %v2734_v29, %v2395_v27 }
  0x46   : > { %2315 = vmatmul.msk.bf16.gmra.mxu2 %vm604_vm2, %v420_v38  ;;  %2323 = vmatmul.msk.bf16.gmra.mxu3 %vm604_vm2, %v420_v38  ;;  %v2364_v38 = vor.u32 %v2726_v35, %v2363_v34  ;;  %v2733_v34 = vld [vmem:[%s3794_s4 + $0x84] sm:$0xf]  ;;  %v2397_v35 = vld [vmem:[%s3794_s4 + $0x88] sm:$0xf0] }
  0x47   : > { %v2400_v36 = vor.u32 %v2733_v34, %v2397_v35 }
  0x48   : > { %1021 = vmatpush.bf16.msrb.mxu0 %v2364_v38 }
  0x49   : > { %1073 = vmatpush.bf16.msrb.mxu1 %v2404_v20 }
  0x4c   : > { %1022 = vmatpush.bf16.msrb.mxu0 %v2356_v50 }
  0x4d   : > { %1074 = vmatpush.bf16.msrb.mxu1 %v2396_v32 }
  0x50   : > { %1023 = vmatpush.bf16.msrb.mxu0 %v2348_v1 }
  0x54   : > { %2292 = vmatmul.msk.bf16.gmra.mxu0 %vm459_vm1, %v445_v43  ;;  %2300 = vmatmul.msk.bf16.gmra.mxu1 %vm459_vm1, %v445_v43  ;;  %v2368_v43 = vor.u32 %v2725_v40, %v2365_v41 }
  0x56   : > { %2316 = vmatmul.msk.bf16.gmra.mxu2 %vm604_vm2, %v421_v44  ;;  %2324 = vmatmul.msk.bf16.gmra.mxu3 %vm604_vm2, %v421_v44  ;;  %v2741_v44 = vld [vmem:[%s3794_s4 + $0xc4] sm:$0xf] }
  0x57   : > { %v2432_v46 = vor.u32 %v2741_v44, %v2429_v45  ;;  %1119 = vmatpush.bf16.msrb.mxu2 %v2368_v43  ;;  %v735_v45 = vperm.slane %v3374_v39, 4 }
  0x59   : > { %1168 = vmatpush.bf16.msrb.mxu3 %v2432_v46  ;;  %v3380_v49 = vperm.slane %v735_v45, 0 }
  0x5b   : > { %1120 = vmatpush.bf16.msrb.mxu2 %v2360_v58 }
  0x5f   : > { %1121 = vmatpush.bf16.msrb.mxu2 %v2352_v10 }
  0x63   : > { %1122 = vmatpush.bf16.msrb.mxu2 %v2344_v21 }
  0x64   : > { %2293 = vmatmul.msk.bf16.gmra.mxu0 %vm459_vm1, %v446_v61  ;;  %2301 = vmatmul.msk.bf16.gmra.mxu1 %vm459_vm1, %v446_v61  ;;  %v417_v61 = vld [vmem:[%s3113_s30 + $0x78] sm:$0xff]  ;;  %s2200_s30 = sshll.u32 %s2196_s19, 4  ;;  %s2201_s30 = int_to_ptr.hbm [resolvable:$true] %s2200_s30 }
  0x65   : > { %s2912_s27 = sshra.s32 %s2201_s30, 4  ;;  %s2913_s27 = int_to_ptr.hbm [resolvable:$true] %s2912_s27 }
  0x66   : > { %2317 = vmatmul.msk.bf16.gmra.mxu2 %vm604_vm2, %v422_v62  ;;  %2325 = vmatmul.msk.bf16.gmra.mxu3 %vm604_vm2, %v422_v62  ;;  %v2424_v62 = vor.u32 %v2739_v55, %v2421_v59  ;;  %s2914_s28 = scalar_lea.hbm %s2913_s27, 1  ;;  %p2919_p3 = scmp.lt.s32.totalorder %s2913_s27, %s3800_s10 }
  0x67   : > { %p2915_p0 = scmp.ne.s32.totalorder %s2913_s27, %s2914_s28  ;;  %p2920_p4 = scmp.lt.s32.totalorder %s2918_s11, %s2914_s28 }
  0x68   : > { %1169 = vmatpush.bf16.msrb.mxu3 %v2424_v62 }
  0x69   : > { %p2916_p1 = pnand %p2915_p0, %p3066_p5  ;;  %p2921_p7 = por %p2920_p4, %p2919_p3 }
  0x6b   : > { %p2917_p2 = pneg %p2916_p1 }
  0x6c   : > { %1170 = vmatpush.bf16.msrb.mxu3 %v2416_v11 }
  0x6d   : > { %p2922_p8 = pnand %p2921_p7, %p2917_p2 }
  0x70   : > { %1171 = vmatpush.bf16.msrb.mxu3 %v2408_v24 }
  0x74   : > { %2294 = vmatmul.msk.bf16.gmra.mxu0 %vm459_vm1, %v447_v15  ;;  %2302 = vmatmul.msk.bf16.gmra.mxu1 %vm459_vm1, %v447_v15  ;;  %v425_v15 = vpack.c.bf16 %v417_v61, %v416_v60 }
  0x75   : > { %1172 = vmatpush.bf16.msrb.mxu3 %v2400_v36 }
  0x76   : > { %2318 = vmatmul.msk.bf16.gmra.mxu2 %vm604_vm2, %v423_v16  ;;  %2326 = vmatmul.msk.bf16.gmra.mxu3 %vm604_vm2, %v423_v16  ;;  %v2340_v16 = vor.u32 %v2720_v13, %v2339_v12 }
  0x78   : > { %1024 = vmatpush.bf16.msrb.mxu0 %v2340_v16 }
  0x7c   : > { %1025 = vmatpush.bf16.msrb.mxu0 %v2332_v28 }
  0x84   : > { %2295 = vmatmul.msk.bf16.gmra.mxu0 %vm459_vm1, %v448_v30  ;;  %2303 = vmatmul.msk.bf16.gmra.mxu1 %vm459_vm1, %v448_v30  ;;  %v2717_v30 = vld [vmem:[%s3794_s4 + $0x4] sm:$0xf] }
  0x85   : > { %v2336_v33 = vor.u32 %v2717_v30, %v2333_v31 }
  0x86   : > { %2319 = vmatmul.msk.bf16.gmra.mxu2 %vm604_vm2, %v424_v37  ;;  %2327 = vmatmul.msk.bf16.gmra.mxu3 %vm604_vm2, %v424_v37 }
  0x87   : > { %1123 = vmatpush.bf16.msrb.mxu2 %v2336_v33 }
  0x94   : > { %2296 = vmatmul.msk.bf16.gmra.mxu0 %vm459_vm1, %v449_v9  ;;  %2304 = vmatmul.msk.bf16.gmra.mxu1 %vm459_vm1, %v449_v9 }
  0x96   : > { %2320 = vmatmul.msk.bf16.gmra.mxu2 %vm604_vm2, %v425_v15  ;;  %2328 = vmatmul.msk.bf16.gmra.mxu3 %vm604_vm2, %v425_v15 }
  0xa1   : > { %v500_v37 = vpop.f32.mrf.mxu0  ;;  %v549_v38 = vpop.f32.mrf.mxu1 }
  0xa9   : > { %v502_v40 = vpop.f32.mrf.mxu0  ;;  %v644_v41 = vpop.f32.mrf.mxu2 }
  0xaa   : > { %v693_v43 = vpop.f32.mrf.mxu3  ;;  %v551_v44 = vpop.f32.mrf.mxu1  ;;  %v645_v46 = vadd.f32 %v644_v41, %v500_v37 }
  0xab   : > { %v694_v48 = vadd.f32 %v693_v43, %v549_v38 }
  0xac   : > { %v740_v52 = vadd.f32 %v3378_v47, %v645_v46 }
  0xad   : > { %v741_v56 = vadd.f32 %v3380_v49, %v694_v48 }
  0xae   : > { %v772_v60 = vmax.f32 %v740_v52, 0.0 }
  0xaf   : > { %v773_v62 = vmax.f32 %v741_v56, 0.0 }
  0xb1   : > { %v505_v50 = vpop.f32.mrf.mxu0  ;;  %v646_v51 = vpop.f32.mrf.mxu2 }
  0xb2   : > { %v647_v53 = vadd.f32 %v646_v51, %v502_v40  ;;  %v695_v54 = vpop.f32.mrf.mxu3  ;;  %v554_v55 = vpop.f32.mrf.mxu1 }
  0xb3   : > { %v696_v57 = vadd.f32 %v695_v54, %v551_v44 }
  0xb4   : > { %v742_v58 = vadd.f32 %v3378_v47, %v647_v53 }
  0xb5   : > { %v743_v59 = vadd.f32 %v3380_v49, %v696_v57 }
  0xb6   : > { %v774_v61 = vmax.f32 %v742_v58, 0.0 }
  0xb7   : > { %v775_v63 = vmax.f32 %v743_v59, 0.0 }
  0xb8   : > { %v804_v0 = vpack.c.bf16 %v774_v61, %v772_v60 }
  0xb9   : > { %v507_v1 = vpop.f32.mrf.mxu0  ;;  %v649_v2 = vpop.f32.mrf.mxu2  ;;  %v805_v3 = vpack.c.bf16 %v775_v63, %v773_v62 }
  0xba   : > { %v698_v4 = vpop.f32.mrf.mxu3  ;;  %1026 = vmatmul.bf16.vlgmr.msrb.gmra.mxu0 %v804_v0  ;;  %1124 = vmatmul.bf16.vlgmr.msrb.gmra.mxu2 %v804_v0  ;;  %v556_v5 = vpop.f32.mrf.mxu1  ;;  %v650_v6 = vadd.f32 %v649_v2, %v505_v50 }
  0xbb   : > { %1075 = vmatmul.bf16.vlgmr.msrb.gmra.mxu1 %v805_v3  ;;  %1173 = vmatmul.bf16.vlgmr.msrb.gmra.mxu3 %v805_v3  ;;  %v699_v7 = vadd.f32 %v698_v4, %v554_v55 }
  0xbc   : > { %v744_v10 = vadd.f32 %v3378_v47, %v650_v6 }
  0xbd   : > { %v745_v14 = vadd.f32 %v3380_v49, %v699_v7 }
  0xbe   : > { %v776_v18 = vmax.f32 %v744_v10, 0.0 }
  0xbf   : > { %v777_v20 = vmax.f32 %v745_v14, 0.0  ;;  %v2517_v14 = vld [vmem:[%s3795_s5 + $0x78] sm:$0xf0] }
  0xc1   : > { %v510_v8 = vpop.f32.mrf.mxu0  ;;  %v651_v9 = vpop.f32.mrf.mxu2 }
  0xc2   : > { %v652_v11 = vadd.f32 %v651_v9, %v507_v1  ;;  %v700_v12 = vpop.f32.mrf.mxu3  ;;  %v559_v13 = vpop.f32.mrf.mxu1 }
  0xc3   : > { %v701_v15 = vadd.f32 %v700_v12, %v556_v5 }
  0xc4   : > { %v746_v16 = vadd.f32 %v3378_v47, %v652_v11 }
  0xc5   : > { %v747_v17 = vadd.f32 %v3380_v49, %v701_v15 }
  0xc6   : > { %v778_v19 = vmax.f32 %v746_v16, 0.0  ;;  %v2779_v16 = vld [vmem:[%s3795_s5 + $0xf4] sm:$0xf] }
  0xc7   : > { %v779_v21 = vmax.f32 %v747_v17, 0.0  ;;  %v2581_v17 = vld [vmem:[%s3795_s5 + $0xf8] sm:$0xf0] }
  0xc8   : > { %v806_v22 = vpack.c.bf16 %v778_v19, %v776_v18 }
  0xc9   : > { %v512_v23 = vpop.f32.mrf.mxu0  ;;  %v654_v24 = vpop.f32.mrf.mxu2  ;;  %v807_v25 = vpack.c.bf16 %v779_v21, %v777_v20  ;;  %v2584_v20 = vor.u32 %v2779_v16, %v2581_v17  ;;  %v2759_v16 = vld [vmem:[%s3795_s5 + $0x54] sm:$0xf]  ;;  %v2501_v17 = vld [vmem:[%s3795_s5 + $0x58] sm:$0xf0] }
  0xca   : > { %v703_v26 = vpop.f32.mrf.mxu3  ;;  %1031 = vmatmul.bf16.gmra.mxu0 %v806_v22  ;;  %1129 = vmatmul.bf16.gmra.mxu2 %v806_v22  ;;  %v561_v27 = vpop.f32.mrf.mxu1  ;;  %v655_v28 = vadd.f32 %v654_v24, %v510_v8 }
  0xcb   : > { %1080 = vmatmul.bf16.gmra.mxu1 %v807_v25  ;;  %1178 = vmatmul.bf16.gmra.mxu3 %v807_v25  ;;  %v704_v29 = vadd.f32 %v703_v26, %v559_v13  ;;  %v2763_v13 = vld [vmem:[%s3795_s5 + $0x74] sm:$0xf] }
  0xcc   : > { %v748_v32 = vadd.f32 %v3378_v47, %v655_v28  ;;  %v2520_v15 = vor.u32 %v2763_v13, %v2517_v14  ;;  %1607 = vmatpush.bf16.msra.mxu3 %v2584_v20  ;;  %v2565_v20 = vld [vmem:[%s3795_s5 + $0xd8] sm:$0xf0] }
  0xcd   : > { %v749_v36 = vadd.f32 %v3380_v49, %v704_v29 }
  0xce   : > { %v780_v41 = vmax.f32 %v748_v32, 0.0  ;;  %1558 = vmatpush.bf16.msra.mxu2 %v2520_v15 }
  0xcf   : > { %v781_v43 = vmax.f32 %v749_v36, 0.0 }
  0xd1   : > { %v515_v30 = vpop.f32.mrf.mxu0  ;;  %v656_v31 = vpop.f32.mrf.mxu2 }
  0xd2   : > { %v657_v33 = vadd.f32 %v656_v31, %v512_v23  ;;  %v705_v34 = vpop.f32.mrf.mxu3  ;;  %v564_v35 = vpop.f32.mrf.mxu1 }
  0xd3   : > { %v706_v37 = vadd.f32 %v705_v34, %v561_v27  ;;  %v2764_v34 = vld [vmem:[%s3795_s5 + $0x74] sm:$0xf0] }
  0xd4   : > { %v750_v38 = vadd.f32 %v3378_v47, %v657_v33  ;;  %v2515_v33 = vld [vmem:[%s3795_s5 + $0x70] sm:$0xf] }
  0xd5   : > { %v751_v40 = vadd.f32 %v3380_v49, %v706_v37  ;;  %v2516_v36 = vor.u32 %v2764_v34, %v2515_v33  ;;  %v2579_v37 = vld [vmem:[%s3795_s5 + $0xf0] sm:$0xf]  ;;  %v2757_v33 = vld [vmem:[%s3795_s5 + $0x44] sm:$0xf] }
  0xd6   : > { %v782_v42 = vmax.f32 %v750_v38, 0.0  ;;  %v2780_v38 = vld [vmem:[%s3795_s5 + $0xf4] sm:$0xf0] }
  0xd7   : > { %v783_v44 = vmax.f32 %v751_v40, 0.0  ;;  %1460 = vmatpush.bf16.msra.mxu0 %v2516_v36 }
  0xd8   : > { %v808_v45 = vpack.c.bf16 %v782_v42, %v780_v41 }
  0xd9   : > { %v517_v46 = vpop.f32.mrf.mxu0  ;;  %v659_v48 = vpop.f32.mrf.mxu2  ;;  %v809_v50 = vpack.c.bf16 %v783_v44, %v781_v43  ;;  %v2580_v43 = vor.u32 %v2780_v38, %v2579_v37 }
  0xda   : > { %v708_v51 = vpop.f32.mrf.mxu3  ;;  %1036 = vmatmul.bf16.gmra.mxu0 %v808_v45  ;;  %1134 = vmatmul.bf16.gmra.mxu2 %v808_v45  ;;  %v566_v52 = vpop.f32.mrf.mxu1  ;;  %v660_v53 = vadd.f32 %v659_v48, %v515_v30 }
  0xdb   : > { %1085 = vmatmul.bf16.gmra.mxu1 %v809_v50  ;;  %1183 = vmatmul.bf16.gmra.mxu3 %v809_v50  ;;  %v709_v54 = vadd.f32 %v708_v51, %v564_v35  ;;  %v2761_v50 = vld [vmem:[%s3795_s5 + $0x64] sm:$0xf]  ;;  %v2509_v51 = vld [vmem:[%s3795_s5 + $0x68] sm:$0xf0] }
  0xdc   : > { %v752_v57 = vadd.f32 %v3378_v47, %v660_v53  ;;  %1509 = vmatpush.bf16.msra.mxu1 %v2580_v43  ;;  %v2777_v53 = vld [vmem:[%s3795_s5 + $0xe4] sm:$0xf] }
  0xdd   : > { %v753_v61 = vadd.f32 %v3380_v49, %v709_v54  ;;  %v2573_v54 = vld [vmem:[%s3795_s5 + $0xe8] sm:$0xf0] }
  0xde   : > { %v784_v1 = vmax.f32 %v752_v57, 0.0 }
  0xdf   : > { %v785_v3 = vmax.f32 %v753_v61, 0.0 }
  0xe1   : > { %v520_v55 = vpop.f32.mrf.mxu0  ;;  %v661_v56 = vpop.f32.mrf.mxu2 }
  0xe2   : > { %v662_v58 = vadd.f32 %v661_v56, %v517_v46  ;;  %v710_v59 = vpop.f32.mrf.mxu3  ;;  %v569_v60 = vpop.f32.mrf.mxu1  ;;  %v2576_v56 = vor.u32 %v2777_v53, %v2573_v54  ;;  %v2483_v54 = vld [vmem:[%s3795_s5 + $0x30] sm:$0xf] }
  0xe3   : > { %v711_v62 = vadd.f32 %v710_v59, %v566_v52  ;;  %v2512_v52 = vor.u32 %v2761_v50, %v2509_v51 }
  0xe4   : > { %v754_v63 = vadd.f32 %v3378_v47, %v662_v58  ;;  %1608 = vmatpush.bf16.msra.mxu3 %v2576_v56 }
  0xe5   : > { %v755_v0 = vadd.f32 %v3380_v49, %v711_v62  ;;  %1559 = vmatpush.bf16.msra.mxu2 %v2512_v52 }
  0xe6   : > { %v786_v2 = vmax.f32 %v754_v63, 0.0 }
  0xe7   : > { %v787_v4 = vmax.f32 %v755_v0, 0.0 }
  0xe8   : > { %v810_v5 = vpack.c.bf16 %v786_v2, %v784_v1 }
  0xe9   : > { %v522_v6 = vpop.f32.mrf.mxu0  ;;  %v664_v7 = vpop.f32.mrf.mxu2  ;;  %v811_v8 = vpack.c.bf16 %v787_v4, %v785_v3 }
  0xea   : > { %v713_v9 = vpop.f32.mrf.mxu3  ;;  %1041 = vmatmul.bf16.gmra.mxu0 %v810_v5  ;;  %1139 = vmatmul.bf16.gmra.mxu2 %v810_v5  ;;  %v571_v10 = vpop.f32.mrf.mxu1  ;;  %v665_v11 = vadd.f32 %v664_v7, %v520_v55  ;;  %v2762_v7 = vld [vmem:[%s3795_s5 + $0x64] sm:$0xf0] }
  0xeb   : > { %1090 = vmatmul.bf16.gmra.mxu1 %v811_v8  ;;  %1188 = vmatmul.bf16.gmra.mxu3 %v811_v8  ;;  %v714_v12 = vadd.f32 %v713_v9, %v569_v60 }
  0xec   : > { %v756_v21 = vadd.f32 %v3378_v47, %v665_v11  ;;  %v2778_v11 = vld [vmem:[%s3795_s5 + $0xe4] sm:$0xf0] }
  0xed   : > { %v757_v25 = vadd.f32 %v3380_v49, %v714_v12 }
  0xee   : > { %v788_v29 = vmax.f32 %v756_v21, 0.0  ;;  %v2499_v21 = vld [vmem:[%s3795_s5 + $0x50] sm:$0xf] }
  0xef   : > { %v789_v31 = vmax.f32 %v757_v25, 0.0 }
  0xf1   : > { %v525_v18 = vpop.f32.mrf.mxu0  ;;  %v666_v19 = vpop.f32.mrf.mxu2 }
  0xf2   : > { %v667_v22 = vadd.f32 %v666_v19, %v522_v6  ;;  %v715_v23 = vpop.f32.mrf.mxu3  ;;  %v574_v24 = vpop.f32.mrf.mxu1  ;;  %v2507_v6 = vld [vmem:[%s3795_s5 + $0x60] sm:$0xf]  ;;  %v2504_v19 = vor.u32 %v2759_v16, %v2501_v17  ;;  %v2771_v17 = vld [vmem:[%s3795_s5 + $0xb4] sm:$0xf] }
  0xf3   : > { %v716_v26 = vadd.f32 %v715_v23, %v571_v10  ;;  %v2508_v9 = vor.u32 %v2762_v7, %v2507_v6  ;;  %v2571_v10 = vld [vmem:[%s3795_s5 + $0xe0] sm:$0xf] }
  0xf4   : > { %v758_v27 = vadd.f32 %v3378_v47, %v667_v22  ;;  %v2572_v14 = vor.u32 %v2778_v11, %v2571_v10  ;;  %v2760_v22 = vld [vmem:[%s3795_s5 + $0x54] sm:$0xf0]  ;;  %1560 = vmatpush.bf16.msra.mxu2 %v2504_v19  ;;  %v2475_v7 = vld [vmem:[%s3795_s5 + $0x20] sm:$0xf]  ;;  %v2753_v10 = vld [vmem:[%s3795_s5 + $0x24] sm:$0xf] }
  0xf5   : > { %v759_v28 = vadd.f32 %v3380_v49, %v716_v26  ;;  %1461 = vmatpush.bf16.msra.mxu0 %v2508_v9  ;;  %v2500_v25 = vor.u32 %v2760_v22, %v2499_v21  ;;  %v2563_v26 = vld [vmem:[%s3795_s5 + $0xd0] sm:$0xf]  ;;  %v2477_v11 = vld [vmem:[%s3795_s5 + $0x28] sm:$0xf0]  ;;  %v2752_v22 = vld [vmem:[%s3795_s5 + $0x14] sm:$0xf0] }
  0xf6   : > { %v790_v30 = vmax.f32 %v758_v27, 0.0  ;;  %1510 = vmatpush.bf16.msra.mxu1 %v2572_v14  ;;  %v2776_v27 = vld [vmem:[%s3795_s5 + $0xd4] sm:$0xf0]  ;;  %v2467_v21 = vld [vmem:[%s3795_s5 + $0x10] sm:$0xf] }
  0xf7   : > { %v791_v32 = vmax.f32 %v759_v28, 0.0  ;;  %v2491_v28 = vld [vmem:[%s3795_s5 + $0x40] sm:$0xf]  ;;  %v2772_v14 = vld [vmem:[%s3795_s5 + $0xb4] sm:$0xf0] }
  0xf8   : > { %v812_v35 = vpack.c.bf16 %v790_v30, %v788_v29 }
  0xf9   : > { %v527_v40 = vpop.f32.mrf.mxu0  ;;  %v669_v41 = vpop.f32.mrf.mxu2  ;;  %v813_v42 = vpack.c.bf16 %v791_v32, %v789_v31  ;;  %v2564_v31 = vor.u32 %v2776_v27, %v2563_v26  ;;  %v2758_v32 = vld [vmem:[%s3795_s5 + $0x44] sm:$0xf0]  ;;  %1462 = vmatpush.bf16.msra.mxu0 %v2500_v25  ;;  %v2469_v25 = vld [vmem:[%s3795_s5 + $0x18] sm:$0xf0] }
  0xfa   : > { %v718_v44 = vpop.f32.mrf.mxu3  ;;  %1046 = vmatmul.bf16.gmra.mxu0 %v812_v35  ;;  %1144 = vmatmul.bf16.gmra.mxu2 %v812_v35  ;;  %v576_v45 = vpop.f32.mrf.mxu1  ;;  %v670_v46 = vadd.f32 %v669_v41, %v525_v18  ;;  %v2775_v18 = vld [vmem:[%s3795_s5 + $0xd4] sm:$0xf]  ;;  %v2493_v35 = vld [vmem:[%s3795_s5 + $0x48] sm:$0xf0]  ;;  %v2492_v36 = vor.u32 %v2758_v32, %v2491_v28 }
  0xfb   : > { %1095 = vmatmul.bf16.gmra.mxu1 %v813_v42  ;;  %1193 = vmatmul.bf16.gmra.mxu3 %v813_v42  ;;  %v719_v48 = vadd.f32 %v718_v44, %v574_v24  ;;  %v2568_v24 = vor.u32 %v2775_v18, %v2565_v20  ;;  %v2496_v37 = vor.u32 %v2757_v33, %v2493_v35  ;;  %v2549_v18 = vld [vmem:[%s3795_s5 + $0xb8] sm:$0xf0] }
  0xfc   : > { %v760_v57 = vadd.f32 %v3378_v47, %v670_v46  ;;  %1511 = vmatpush.bf16.msra.mxu1 %v2564_v31  ;;  %v2552_v20 = vor.u32 %v2771_v17, %v2549_v18  ;;  %v2769_v31 = vld [vmem:[%s3795_s5 + $0xa4] sm:$0xf] }
  0xfd   : > { %v761_v60 = vadd.f32 %v3380_v49, %v719_v48  ;;  %1609 = vmatpush.bf16.msra.mxu3 %v2568_v24  ;;  %1561 = vmatpush.bf16.msra.mxu2 %v2496_v37  ;;  %v2751_v24 = vld [vmem:[%s3795_s5 + $0x14] sm:$0xf]  ;;  %v2541_v37 = vld [vmem:[%s3795_s5 + $0xa8] sm:$0xf0] }
  0xfe   : > { %v792_v2 = vmax.f32 %v760_v57, 0.0  ;;  %1463 = vmatpush.bf16.msra.mxu0 %v2492_v36  ;;  %v2472_v28 = vor.u32 %v2751_v24, %v2469_v25 }
  0xff   : > { %v793_v4 = vmax.f32 %v761_v60, 0.0  ;;  %v2485_v60 = vld [vmem:[%s3795_s5 + $0x38] sm:$0xf0] }
 0x101   : > { %v671_v55 = vpop.f32.mrf.mxu2  ;;  %v530_v61 = vpop.f32.mrf.mxu0 }
 0x102   : > { %v672_v58 = vadd.f32 %v671_v55, %v527_v40  ;;  %v720_v59 = vpop.f32.mrf.mxu3  ;;  %v579_v0 = vpop.f32.mrf.mxu1  ;;  %v2756_v55 = vld [vmem:[%s3795_s5 + $0x34] sm:$0xf0] }
 0x103   : > { %v721_v62 = vadd.f32 %v720_v59, %v576_v45  ;;  %v2755_v59 = vld [vmem:[%s3795_s5 + $0x34] sm:$0xf] }
 0x104   : > { %v762_v63 = vadd.f32 %v3378_v47, %v672_v58  ;;  %v2484_v58 = vor.u32 %v2756_v55, %v2483_v54 }
 0x105   : > { %v763_v1 = vadd.f32 %v3380_v49, %v721_v62 }
 0x106   : > { %v794_v3 = vmax.f32 %v762_v63, 0.0  ;;  %v2488_v63 = vor.u32 %v2755_v59, %v2485_v60  ;;  %1464 = vmatpush.bf16.msra.mxu0 %v2484_v58 }
 0x107   : > { %v795_v5 = vmax.f32 %v763_v1, 0.0  ;;  %v2774_v1 = vld [vmem:[%s3795_s5 + $0xc4] sm:$0xf0] }
 0x108   : > { %v814_v8 = vpack.c.bf16 %v794_v3, %v792_v2  ;;  %v2773_v2 = vld [vmem:[%s3795_s5 + $0xc4] sm:$0xf]  ;;  %1562 = vmatpush.bf16.msra.mxu2 %v2488_v63  ;;  %v2766_v63 = vld [vmem:[%s3795_s5 + $0x84] sm:$0xf0] }
 0x109   : > { %v674_v12 = vpop.f32.mrf.mxu2  ;;  %v815_v13 = vpack.c.bf16 %v795_v5, %v793_v4  ;;  %v532_v23 = vpop.f32.mrf.mxu0  ;;  %v2557_v5 = vld [vmem:[%s3795_s5 + $0xc8] sm:$0xf0] }
 0x10a   : > { %v723_v15 = vpop.f32.mrf.mxu3  ;;  %1051 = vmatmul.bf16.gmra.mxu0 %v814_v8  ;;  %1149 = vmatmul.bf16.gmra.mxu2 %v814_v8  ;;  %v675_v29 = vadd.f32 %v674_v12, %v530_v61  ;;  %v581_v30 = vpop.f32.mrf.mxu1  ;;  %v2560_v6 = vor.u32 %v2773_v2, %v2557_v5  ;;  %v2754_v8 = vld [vmem:[%s3795_s5 + $0x24] sm:$0xf0]  ;;  %v2480_v12 = vor.u32 %v2753_v10, %v2477_v11  ;;  %v2525_v2 = vld [vmem:[%s3795_s5 + $0x88] sm:$0xf0] }
 0x10b   : > { %1100 = vmatmul.bf16.gmra.mxu1 %v815_v13  ;;  %1198 = vmatmul.bf16.gmra.mxu3 %v815_v13  ;;  %v724_v34 = vadd.f32 %v723_v15, %v579_v0  ;;  %v2555_v0 = vld [vmem:[%s3795_s5 + $0xc0] sm:$0xf]  ;;  %v2476_v9 = vor.u32 %v2754_v8, %v2475_v7  ;;  %v2547_v13 = vld [vmem:[%s3795_s5 + $0xb0] sm:$0xf]  ;;  %v853_v8 = vperm.slane %v3374_v39, 5 }
 0x10c   : > { %v764_v40 = vadd.f32 %v3378_v47, %v675_v29  ;;  %v2556_v4 = vor.u32 %v2774_v1, %v2555_v0  ;;  %1610 = vmatpush.bf16.msra.mxu3 %v2560_v6  ;;  %v2548_v16 = vor.u32 %v2772_v14, %v2547_v13  ;;  %1563 = vmatpush.bf16.msra.mxu2 %v2480_v12  ;;  %v2539_v29 = vld [vmem:[%s3795_s5 + $0xa0] sm:$0xf]  ;;  %v2765_v0 = vld [vmem:[%s3795_s5 + $0x84] sm:$0xf] }
 0x10d   : > { %v765_v43 = vadd.f32 %v3380_v49, %v724_v34  ;;  %1465 = vmatpush.bf16.msra.mxu0 %v2476_v9  ;;  %v3611_v11 = vperm.slane %v853_v8, 1 }
 0x10e   : > { %v796_v48 = vmax.f32 %v764_v40, 0.0  ;;  %1512 = vmatpush.bf16.msra.mxu1 %v2556_v4  ;;  %v852_v4 = vperm.slane %v3374_v39, 1 }
 0x10f   : > { %v797_v51 = vmax.f32 %v765_v43, 0.0  ;;  %v2750_v43 = vld [vmem:[%s3795_s5 + $0x4] sm:$0xf0] }
 0x110   : > { %1611 = vmatpush.bf16.msra.mxu3 %v2552_v20  ;;  %1564 = vmatpush.bf16.msra.mxu2 %v2472_v28  ;;  %v3607_v6 = vperm.slane %v852_v4, 1 }
 0x111   : > { %v676_v38 = vpop.f32.mrf.mxu2  ;;  %v535_v52 = vpop.f32.mrf.mxu0 }
 0x112   : > { %v677_v41 = vadd.f32 %v676_v38, %v532_v23  ;;  %v725_v42 = vpop.f32.mrf.mxu3  ;;  %v584_v56 = vpop.f32.mrf.mxu1  ;;  %v2468_v23 = vor.u32 %v2752_v22, %v2467_v21  ;;  %1513 = vmatpush.bf16.msra.mxu1 %v2548_v16 }
 0x113   : > { %v726_v44 = vadd.f32 %v725_v42, %v581_v30  ;;  %v2770_v30 = vld [vmem:[%s3795_s5 + $0xa4] sm:$0xf0]  ;;  %v2459_v42 = vld [vmem:[%s3795_s5] sm:$0xf] }
 0x114   : > { %v766_v45 = vadd.f32 %v3378_v47, %v677_v41  ;;  %v2540_v36 = vor.u32 %v2770_v30, %v2539_v29  ;;  %v2544_v41 = vor.u32 %v2769_v31, %v2541_v37  ;;  %1466 = vmatpush.bf16.msra.mxu0 %v2468_v23 }
 0x115   : > { %v767_v46 = vadd.f32 %v3380_v49, %v726_v44  ;;  %v2749_v44 = vld [vmem:[%s3795_s5 + $0x4] sm:$0xf] }
 0x116   : > { %v798_v50 = vmax.f32 %v766_v45, 0.0  ;;  %1514 = vmatpush.bf16.msra.mxu1 %v2540_v36  ;;  %1612 = vmatpush.bf16.msra.mxu3 %v2544_v41 }
 0x117   : > { %v799_v53 = vmax.f32 %v767_v46, 0.0  ;;  %v2460_v46 = vor.u32 %v2750_v43, %v2459_v42 }
 0x118   : > { %v816_v57 = vpack.c.bf16 %v798_v50, %v796_v48  ;;  %v2461_v48 = vld [vmem:[%s3795_s5 + $0x8] sm:$0xf0] }
 0x119   : > { %v679_v61 = vpop.f32.mrf.mxu2  ;;  %v817_v62 = vpack.c.bf16 %v799_v53, %v797_v51  ;;  %v537_v26 = vpop.f32.mrf.mxu0  ;;  %v2464_v51 = vor.u32 %v2749_v44, %v2461_v48  ;;  %v2767_v53 = vld [vmem:[%s3795_s5 + $0x94] sm:$0xf]  ;;  %1467 = vmatpush.bf16.msra.mxu0 %v2460_v46 }
 0x11a   : > { %v728_v3 = vpop.f32.mrf.mxu3  ;;  %1056 = vmatmul.bf16.gmra.mxu0 %v816_v57  ;;  %1154 = vmatmul.bf16.gmra.mxu2 %v816_v57  ;;  %v680_v15 = vadd.f32 %v679_v61, %v535_v52  ;;  %v586_v33 = vpop.f32.mrf.mxu1  ;;  %v2531_v52 = vld [vmem:[%s3795_s5 + $0x90] sm:$0xf] }
 0x11b   : > { %1105 = vmatmul.bf16.gmra.mxu1 %v817_v62  ;;  %1203 = vmatmul.bf16.gmra.mxu3 %v817_v62  ;;  %v729_v19 = vadd.f32 %v728_v3, %v584_v56  ;;  %v2523_v62 = vld [vmem:[%s3795_s5 + $0x80] sm:$0xf]  ;;  %v2528_v3 = vor.u32 %v2765_v0, %v2525_v2 }
 0x11c   : > { %v768_v32 = vadd.f32 %v3378_v47, %v680_v15  ;;  %1565 = vmatpush.bf16.msra.mxu2 %v2464_v51  ;;  %v2524_v1 = vor.u32 %v2766_v63, %v2523_v62 }
 0x11d   : > { %v769_v38 = vadd.f32 %v3380_v49, %v729_v19 }
 0x11e   : > { %v800_v54 = vmax.f32 %v768_v32, 0.0 }
 0x11f   : > { %v801_v57 = vmax.f32 %v769_v38, 0.0 }
 0x121   : > { %v681_v27 = vpop.f32.mrf.mxu2 }
 0x122   : > { %v682_v34 = vadd.f32 %v681_v27, %v537_v26  ;;  %v730_v35 = vpop.f32.mrf.mxu3 }
 0x123   : > { %v731_v40 = vadd.f32 %v730_v35, %v586_v33 }
 0x124   : > { %v770_v45 = vadd.f32 %v3378_v47, %v682_v34  ;;  %v2768_v47 = vld [vmem:[%s3795_s5 + $0x94] sm:$0xf0] }
 0x125   : > { %v771_v50 = vadd.f32 %v3380_v49, %v731_v40  ;;  %v2532_v56 = vor.u32 %v2768_v47, %v2531_v52  ;;  %v2533_v49 = vld [vmem:[%s3795_s5 + $0x98] sm:$0xf0] }
 0x126   : > { %v802_v55 = vmax.f32 %v770_v45, 0.0  ;;  %v2536_v59 = vor.u32 %v2767_v53, %v2533_v49 }
 0x127   : > { %v803_v58 = vmax.f32 %v771_v50, 0.0  ;;  %1515 = vmatpush.bf16.msra.mxu1 %v2532_v56 }
 0x128   : > { %v818_v60 = vpack.c.bf16 %v802_v55, %v800_v54  ;;  %1613 = vmatpush.bf16.msra.mxu3 %v2536_v59 }
 0x129   : > { %v819_v61 = vpack.c.bf16 %v803_v58, %v801_v57 }
 0x12a   : > { %1061 = vmatmul.bf16.gmra.mxu0 %v818_v60  ;;  %1159 = vmatmul.bf16.gmra.mxu2 %v818_v60 }
 0x12b   : > { %1110 = vmatmul.bf16.gmra.mxu1 %v819_v61  ;;  %1208 = vmatmul.bf16.gmra.mxu3 %v819_v61 }
 0x12c   : > { %1516 = vmatpush.bf16.msra.mxu1 %v2524_v1  ;;  %1614 = vmatpush.bf16.msra.mxu3 %v2528_v3 }
 0x137   : > { %v1027_v5 = vpop.f32.mrf.mxu0 }
 0x138   : > { %v1076_v7 = vpop.f32.mrf.mxu1  ;;  %v1028_v9 = vadd.f32 %v1027_v5, %v3607_v6 }
 0x13a   : > { %v1077_v14 = vadd.f32 %v1076_v7, %v1028_v9 }
 0x13c   : > { %v1214_v19 = vmax.f32 %v1077_v14, 0.0 }
 0x13d   : > { %v1125_v10 = vpop.f32.mrf.mxu2 }
 0x13e   : > { %v1174_v12 = vpop.f32.mrf.mxu3  ;;  %v1126_v17 = vadd.f32 %v1125_v10, %v3611_v11 }
 0x13f   : > { %v1029_v13 = vpop.f32.mrf.mxu0 }
 0x140   : > { %v1030_v15 = vadd.f32 %v1029_v13, %v3607_v6  ;;  %v1078_v16 = vpop.f32.mrf.mxu1  ;;  %v1175_v22 = vadd.f32 %v1174_v12, %v1126_v17 }
 0x142   : > { %v1079_v18 = vadd.f32 %v1078_v16, %v1030_v15  ;;  %v1215_v28 = vmax.f32 %v1175_v22, 0.0 }
 0x144   : > { %v1216_v20 = vmax.f32 %v1079_v18, 0.0 }
 0x145   : > { %v1127_v21 = vpop.f32.mrf.mxu2 }
 0x146   : > { %v1246_v23 = vpack.c.bf16 %v1216_v20, %v1214_v19  ;;  %v1128_v39 = vadd.f32 %v1127_v21, %v3611_v11  ;;  %v1176_v24 = vpop.f32.mrf.mxu3 }
 0x147   : > { %v1032_v25 = vpop.f32.mrf.mxu0 }
 0x148   : > { %v1177_v26 = vadd.f32 %v1176_v24, %v1128_v39  ;;  %v1081_v27 = vpop.f32.mrf.mxu1  ;;  %1468 = vmatmul.bf16.vlgmr.msra.gmra.mxu0 %v1246_v23  ;;  %1566 = vmatmul.bf16.vlgmr.msra.gmra.mxu2 %v1246_v23  ;;  %v1033_v31 = vadd.f32 %v1032_v25, %v3607_v6 }
 0x14a   : > { %v1217_v29 = vmax.f32 %v1177_v26, 0.0  ;;  %v1082_v35 = vadd.f32 %v1081_v27, %v1033_v31 }
 0x14c   : > { %v1247_v30 = vpack.c.bf16 %v1217_v29, %v1215_v28  ;;  %v1218_v41 = vmax.f32 %v1082_v35, 0.0 }
 0x14d   : > { %v1130_v32 = vpop.f32.mrf.mxu2 }
 0x14e   : > { %v1179_v33 = vpop.f32.mrf.mxu3  ;;  %1517 = vmatmul.bf16.vlgmr.msra.gmra.mxu1 %v1247_v30  ;;  %1615 = vmatmul.bf16.vlgmr.msra.gmra.mxu3 %v1247_v30  ;;  %v1131_v38 = vadd.f32 %v1130_v32, %v3611_v11 }
 0x14f   : > { %v1034_v34 = vpop.f32.mrf.mxu0 }
 0x150   : > { %v1035_v36 = vadd.f32 %v1034_v34, %v3607_v6  ;;  %v1083_v37 = vpop.f32.mrf.mxu1  ;;  %v1180_v44 = vadd.f32 %v1179_v33, %v1131_v38 }
 0x152   : > { %v1084_v40 = vadd.f32 %v1083_v37, %v1035_v36  ;;  %v1219_v47 = vmax.f32 %v1180_v44, 0.0 }
 0x154   : > { %v1220_v42 = vmax.f32 %v1084_v40, 0.0 }
 0x155   : > { %v1132_v43 = vpop.f32.mrf.mxu2 }
 0x156   : > { %v1133_v45 = vadd.f32 %v1132_v43, %v3611_v11  ;;  %v1181_v46 = vpop.f32.mrf.mxu3  ;;  %v1248_v48 = vpack.c.bf16 %v1220_v42, %v1218_v41 }
 0x157   : > { %v1037_v50 = vpop.f32.mrf.mxu0 }
 0x158   : > { %v1182_v51 = vadd.f32 %v1181_v46, %v1133_v45  ;;  %v1086_v52 = vpop.f32.mrf.mxu1  ;;  %1473 = vmatmul.bf16.gmra.mxu0 %v1248_v48  ;;  %1571 = vmatmul.bf16.gmra.mxu2 %v1248_v48  ;;  %v1038_v54 = vadd.f32 %v1037_v50, %v3607_v6  ;;  %v2795_v48 = vld [vmem:[#allocation3 + $0x74] sm:$0xf]  ;;  %v2645_v50 = vld [vmem:[#allocation3 + $0x78] sm:$0xf0] }
 0x15a   : > { %v1221_v53 = vmax.f32 %v1182_v51, 0.0  ;;  %v1087_v58 = vadd.f32 %v1086_v52, %v1038_v54  ;;  %v2648_v52 = vor.u32 %v2795_v48, %v2645_v50  ;;  %v2807_v48 = vld [vmem:[#allocation3 + $0xd4] sm:$0xf] }
 0x15c   : > { %v1249_v55 = vpack.c.bf16 %v1221_v53, %v1219_v47  ;;  %v1222_v63 = vmax.f32 %v1087_v58, 0.0  ;;  %v2811_v47 = vld [vmem:[#allocation3 + $0xf4] sm:$0xf]  ;;  %v2709_v53 = vld [vmem:[#allocation3 + $0xf8] sm:$0xf0]  ;;  %2000 = vmatpush.bf16.msrb.mxu2 %v2648_v52 }
 0x15d   : > { %v1135_v56 = vpop.f32.mrf.mxu2  ;;  %v2693_v52 = vld [vmem:[#allocation3 + $0xd8] sm:$0xf0] }
 0x15e   : > { %v1184_v49 = vpop.f32.mrf.mxu3  ;;  %1522 = vmatmul.bf16.gmra.mxu1 %v1249_v55  ;;  %1620 = vmatmul.bf16.gmra.mxu3 %v1249_v55  ;;  %v1136_v61 = vadd.f32 %v1135_v56, %v3611_v11 }
 0x15f   : > { %v1039_v57 = vpop.f32.mrf.mxu0 }
 0x160   : > { %v1040_v59 = vadd.f32 %v1039_v57, %v3607_v6  ;;  %v1088_v60 = vpop.f32.mrf.mxu1  ;;  %v1185_v2 = vadd.f32 %v1184_v49, %v1136_v61  ;;  %v2712_v57 = vor.u32 %v2811_v47, %v2709_v53  ;;  %v2627_v47 = vld [vmem:[#allocation3 + $0x50] sm:$0xf]  ;;  %v2792_v53 = vld [vmem:[#allocation3 + $0x54] sm:$0xf0] }
 0x162   : > { %v1089_v62 = vadd.f32 %v1088_v60, %v1040_v59  ;;  %v1223_v10 = vmax.f32 %v1185_v2, 0.0  ;;  %2049 = vmatpush.bf16.msrb.mxu3 %v2712_v57  ;;  %v2628_v57 = vor.u32 %v2792_v53, %v2627_v47  ;;  %v2595_v47 = vld [vmem:[#allocation3 + $0x10] sm:$0xf]  ;;  %v2784_v53 = vld [vmem:[#allocation3 + $0x14] sm:$0xf0] }
 0x164   : > { %v1224_v0 = vmax.f32 %v1089_v62, 0.0 }
 0x165   : > { %v1137_v1 = vpop.f32.mrf.mxu2 }
 0x166   : > { %v1138_v3 = vadd.f32 %v1137_v1, %v3611_v11  ;;  %v1186_v4 = vpop.f32.mrf.mxu3  ;;  %v1250_v5 = vpack.c.bf16 %v1224_v0, %v1222_v63  ;;  %v2643_v63 = vld [vmem:[#allocation3 + $0x70] sm:$0xf]  ;;  %v2796_v0 = vld [vmem:[#allocation3 + $0x74] sm:$0xf0] }
 0x167   : > { %v1042_v7 = vpop.f32.mrf.mxu0  ;;  %v2644_v1 = vor.u32 %v2796_v0, %v2643_v63  ;;  %v2619_v63 = vld [vmem:[#allocation3 + $0x40] sm:$0xf]  ;;  %v2790_v0 = vld [vmem:[#allocation3 + $0x44] sm:$0xf0] }
 0x168   : > { %v1187_v8 = vadd.f32 %v1186_v4, %v1138_v3  ;;  %v1091_v9 = vpop.f32.mrf.mxu1  ;;  %1478 = vmatmul.bf16.gmra.mxu0 %v1250_v5  ;;  %1576 = vmatmul.bf16.gmra.mxu2 %v1250_v5  ;;  %v1043_v13 = vadd.f32 %v1042_v7, %v3607_v6  ;;  %v2707_v4 = vld [vmem:[#allocation3 + $0xf0] sm:$0xf]  ;;  %v2812_v5 = vld [vmem:[#allocation3 + $0xf4] sm:$0xf0] }
 0x169   : > { %1902 = vmatpush.bf16.msrb.mxu0 %v2644_v1  ;;  %v2789_v1 = vld [vmem:[#allocation3 + $0x44] sm:$0xf] }
 0x16a   : > { %v1225_v12 = vmax.f32 %v1187_v8, 0.0  ;;  %v1092_v18 = vadd.f32 %v1091_v9, %v1043_v13  ;;  %v2708_v8 = vor.u32 %v2812_v5, %v2707_v4 }
 0x16c   : > { %v1251_v14 = vpack.c.bf16 %v1225_v12, %v1223_v10  ;;  %v1226_v23 = vmax.f32 %v1092_v18, 0.0  ;;  %1951 = vmatpush.bf16.msrb.mxu1 %v2708_v8  ;;  %v2691_v8 = vld [vmem:[#allocation3 + $0xd0] sm:$0xf] }
 0x16d   : > { %v1140_v15 = vpop.f32.mrf.mxu2 }
 0x16e   : > { %v1189_v16 = vpop.f32.mrf.mxu3  ;;  %1527 = vmatmul.bf16.gmra.mxu1 %v1251_v14  ;;  %1625 = vmatmul.bf16.gmra.mxu3 %v1251_v14  ;;  %v1141_v21 = vadd.f32 %v1140_v15, %v3611_v11 }
 0x16f   : > { %v1044_v17 = vpop.f32.mrf.mxu0 }
 0x170   : > { %v1045_v19 = vadd.f32 %v1044_v17, %v3607_v6  ;;  %v1093_v20 = vpop.f32.mrf.mxu1  ;;  %v1190_v25 = vadd.f32 %v1189_v16, %v1141_v21 }
 0x172   : > { %v1094_v22 = vadd.f32 %v1093_v20, %v1045_v19  ;;  %v1227_v32 = vmax.f32 %v1190_v25, 0.0  ;;  %v2793_v19 = vld [vmem:[#allocation3 + $0x64] sm:$0xf]  ;;  %v2637_v20 = vld [vmem:[#allocation3 + $0x68] sm:$0xf0] }
 0x174   : > { %v1228_v39 = vmax.f32 %v1094_v22, 0.0  ;;  %v2640_v22 = vor.u32 %v2793_v19, %v2637_v20 }
 0x175   : > { %v1142_v24 = vpop.f32.mrf.mxu2 }
 0x176   : > { %v1143_v26 = vadd.f32 %v1142_v24, %v3611_v11  ;;  %v1191_v27 = vpop.f32.mrf.mxu3  ;;  %v1252_v28 = vpack.c.bf16 %v1228_v39, %v1226_v23  ;;  %v2809_v23 = vld [vmem:[#allocation3 + $0xe4] sm:$0xf]  ;;  %v2701_v39 = vld [vmem:[#allocation3 + $0xe8] sm:$0xf0]  ;;  %2001 = vmatpush.bf16.msrb.mxu2 %v2640_v22  ;;  %v2787_v22 = vld [vmem:[#allocation3 + $0x34] sm:$0xf] }
 0x177   : > { %v1047_v29 = vpop.f32.mrf.mxu0 }
 0x178   : > { %v1192_v30 = vadd.f32 %v1191_v27, %v1143_v26  ;;  %v1096_v31 = vpop.f32.mrf.mxu1  ;;  %1483 = vmatmul.bf16.gmra.mxu0 %v1252_v28  ;;  %1581 = vmatmul.bf16.gmra.mxu2 %v1252_v28  ;;  %v1048_v34 = vadd.f32 %v1047_v29, %v3607_v6  ;;  %v2704_v28 = vor.u32 %v2809_v23, %v2701_v39  ;;  %v2613_v23 = vld [vmem:[#allocation3 + $0x38] sm:$0xf0] }
 0x179   : > { %v2616_v39 = vor.u32 %v2787_v22, %v2613_v23  ;;  %v2651_v23 = vld [vmem:[#allocation3 + $0x80] sm:$0xf] }
 0x17a   : > { %v1229_v33 = vmax.f32 %v1192_v30, 0.0  ;;  %v1097_v40 = vadd.f32 %v1096_v31, %v1048_v34  ;;  %2050 = vmatpush.bf16.msrb.mxu3 %v2704_v28  ;;  %v2635_v34 = vld [vmem:[#allocation3 + $0x60] sm:$0xf] }
 0x17c   : > { %v1253_v35 = vpack.c.bf16 %v1229_v33, %v1227_v32  ;;  %v1230_v45 = vmax.f32 %v1097_v40, 0.0 }
 0x17d   : > { %v1145_v36 = vpop.f32.mrf.mxu2 }
 0x17e   : > { %v1194_v37 = vpop.f32.mrf.mxu3  ;;  %1532 = vmatmul.bf16.gmra.mxu1 %v1253_v35  ;;  %1630 = vmatmul.bf16.gmra.mxu3 %v1253_v35  ;;  %v1146_v43 = vadd.f32 %v1145_v36, %v3611_v11  ;;  %v2794_v35 = vld [vmem:[#allocation3 + $0x64] sm:$0xf0] }
 0x17f   : > { %v1049_v38 = vpop.f32.mrf.mxu0  ;;  %v2636_v36 = vor.u32 %v2794_v35, %v2635_v34  ;;  %v2786_v34 = vld [vmem:[#allocation3 + $0x24] sm:$0xf0]  ;;  %v2785_v35 = vld [vmem:[#allocation3 + $0x24] sm:$0xf] }
 0x180   : > { %v1050_v41 = vadd.f32 %v1049_v38, %v3607_v6  ;;  %v1098_v42 = vpop.f32.mrf.mxu1  ;;  %v1195_v54 = vadd.f32 %v1194_v37, %v1146_v43  ;;  %v2699_v37 = vld [vmem:[#allocation3 + $0xe0] sm:$0xf]  ;;  %v2810_v38 = vld [vmem:[#allocation3 + $0xe4] sm:$0xf0] }
 0x181   : > { %1903 = vmatpush.bf16.msrb.mxu0 %v2636_v36 }
 0x182   : > { %v1099_v44 = vadd.f32 %v1098_v42, %v1050_v41  ;;  %v1231_v61 = vmax.f32 %v1195_v54, 0.0  ;;  %v2700_v42 = vor.u32 %v2810_v38, %v2699_v37  ;;  %v2605_v38 = vld [vmem:[#allocation3 + $0x28] sm:$0xf0] }
 0x184   : > { %v1232_v46 = vmax.f32 %v1099_v44, 0.0  ;;  %1952 = vmatpush.bf16.msrb.mxu1 %v2700_v42  ;;  %v2675_v42 = vld [vmem:[#allocation3 + $0xb0] sm:$0xf] }
 0x185   : > { %v1147_v51 = vpop.f32.mrf.mxu2  ;;  %1904 = vmatpush.bf16.msrb.mxu0 %v2628_v57  ;;  %v2597_v57 = vld [vmem:[#allocation3 + $0x18] sm:$0xf0] }
 0x186   : > { %v1148_v55 = vadd.f32 %v1147_v51, %v3611_v11  ;;  %v1196_v56 = vpop.f32.mrf.mxu3  ;;  %v1254_v49 = vpack.c.bf16 %v1232_v46, %v1230_v45  ;;  %v2791_v45 = vld [vmem:[#allocation3 + $0x54] sm:$0xf]  ;;  %v2629_v46 = vld [vmem:[#allocation3 + $0x58] sm:$0xf0] }
 0x187   : > { %v1052_v58 = vpop.f32.mrf.mxu0  ;;  %v2632_v51 = vor.u32 %v2791_v45, %v2629_v46 }
 0x188   : > { %v1197_v59 = vadd.f32 %v1196_v56, %v1148_v55  ;;  %v1101_v60 = vpop.f32.mrf.mxu1  ;;  %1488 = vmatmul.bf16.gmra.mxu0 %v1254_v49  ;;  %1586 = vmatmul.bf16.gmra.mxu2 %v1254_v49  ;;  %v1053_v2 = vadd.f32 %v1052_v58, %v3607_v6  ;;  %v2696_v49 = vor.u32 %v2807_v48, %v2693_v52 }
 0x189   : > { %2002 = vmatpush.bf16.msrb.mxu2 %v2632_v51 }
 0x18a   : > { %v1233_v62 = vmax.f32 %v1197_v59, 0.0  ;;  %v1102_v12 = vadd.f32 %v1101_v60, %v1053_v2  ;;  %2051 = vmatpush.bf16.msrb.mxu3 %v2696_v49  ;;  %v2596_v49 = vor.u32 %v2784_v53, %v2595_v47 }
 0x18c   : > { %v1255_v3 = vpack.c.bf16 %v1233_v62, %v1231_v61  ;;  %v1234_v17 = vmax.f32 %v1102_v12, 0.0 }
 0x18d   : > { %v1150_v7 = vpop.f32.mrf.mxu2 }
 0x18e   : > { %v1199_v9 = vpop.f32.mrf.mxu3  ;;  %1537 = vmatmul.bf16.gmra.mxu1 %v1255_v3  ;;  %1635 = vmatmul.bf16.gmra.mxu3 %v1255_v3  ;;  %v1151_v15 = vadd.f32 %v1150_v7, %v3611_v11  ;;  %v2620_v7 = vor.u32 %v2790_v0, %v2619_v63  ;;  %v2669_v0 = vld [vmem:[#allocation3 + $0xa8] sm:$0xf0] }
 0x18f   : > { %v1054_v10 = vpop.f32.mrf.mxu0 }
 0x190   : > { %v1055_v13 = vadd.f32 %v1054_v10, %v3607_v6  ;;  %v1103_v14 = vpop.f32.mrf.mxu1  ;;  %v1200_v24 = vadd.f32 %v1199_v9, %v1151_v15  ;;  %v2808_v9 = vld [vmem:[#allocation3 + $0xd4] sm:$0xf0]  ;;  %v2621_v10 = vld [vmem:[#allocation3 + $0x48] sm:$0xf0]  ;;  %1905 = vmatpush.bf16.msrb.mxu0 %v2620_v7 }
 0x192   : > { %v1104_v16 = vadd.f32 %v1103_v14, %v1055_v13  ;;  %v1235_v32 = vmax.f32 %v1200_v24, 0.0  ;;  %v2692_v13 = vor.u32 %v2808_v9, %v2691_v8  ;;  %v2624_v14 = vor.u32 %v2789_v1, %v2621_v10  ;;  %v2683_v24 = vld [vmem:[#allocation3 + $0xc0] sm:$0xf] }
 0x194   : > { %v1236_v18 = vmax.f32 %v1104_v16, 0.0  ;;  %1953 = vmatpush.bf16.msrb.mxu1 %v2692_v13  ;;  %2003 = vmatpush.bf16.msrb.mxu2 %v2624_v14 }
 0x195   : > { %v1152_v21 = vpop.f32.mrf.mxu2 }
 0x196   : > { %v1153_v25 = vadd.f32 %v1152_v21, %v3611_v11  ;;  %v1201_v26 = vpop.f32.mrf.mxu3  ;;  %v1256_v27 = vpack.c.bf16 %v1236_v18, %v1234_v17  ;;  %v2611_v17 = vld [vmem:[#allocation3 + $0x30] sm:$0xf]  ;;  %v2788_v18 = vld [vmem:[#allocation3 + $0x34] sm:$0xf0] }
 0x197   : > { %v1057_v29 = vpop.f32.mrf.mxu0  ;;  %v2612_v21 = vor.u32 %v2788_v18, %v2611_v17  ;;  %v2799_v17 = vld [vmem:[#allocation3 + $0x94] sm:$0xf] }
 0x198   : > { %v1202_v30 = vadd.f32 %v1201_v26, %v1153_v25  ;;  %v1106_v31 = vpop.f32.mrf.mxu1  ;;  %1493 = vmatmul.bf16.gmra.mxu0 %v1256_v27  ;;  %1591 = vmatmul.bf16.gmra.mxu2 %v1256_v27  ;;  %v1058_v40 = vadd.f32 %v1057_v29, %v3607_v6  ;;  %v2806_v25 = vld [vmem:[#allocation3 + $0xc4] sm:$0xf0]  ;;  %v2805_v29 = vld [vmem:[#allocation3 + $0xc4] sm:$0xf] }
 0x199   : > { %v2684_v28 = vor.u32 %v2806_v25, %v2683_v24  ;;  %1906 = vmatpush.bf16.msrb.mxu0 %v2612_v21  ;;  %2004 = vmatpush.bf16.msrb.mxu2 %v2616_v39  ;;  %v2798_v39 = vld [vmem:[#allocation3 + $0x84] sm:$0xf0]  ;;  %v2797_v24 = vld [vmem:[#allocation3 + $0x84] sm:$0xf] }
 0x19a   : > { %v1237_v33 = vmax.f32 %v1202_v30, 0.0  ;;  %v1107_v54 = vadd.f32 %v1106_v31, %v1058_v40  ;;  %v2685_v30 = vld [vmem:[#allocation3 + $0xc8] sm:$0xf0] }
 0x19b   : > { %1954 = vmatpush.bf16.msrb.mxu1 %v2684_v28 }
 0x19c   : > { %v1257_v41 = vpack.c.bf16 %v1237_v33, %v1235_v32  ;;  %v1238_v60 = vmax.f32 %v1107_v54, 0.0  ;;  %v2688_v32 = vor.u32 %v2805_v29, %v2685_v30  ;;  %v2603_v33 = vld [vmem:[#allocation3 + $0x20] sm:$0xf]  ;;  %v2783_v54 = vld [vmem:[#allocation3 + $0x14] sm:$0xf] }
 0x19d   : > { %v1155_v43 = vpop.f32.mrf.mxu2  ;;  %v2604_v37 = vor.u32 %v2786_v34, %v2603_v33  ;;  %v3647_v30 = vld [vmem:[%s3797_s7] sm:$0xff] }
 0x19e   : > { %v1204_v44 = vpop.f32.mrf.mxu3  ;;  %1542 = vmatmul.bf16.gmra.mxu1 %v1257_v41  ;;  %1640 = vmatmul.bf16.gmra.mxu3 %v1257_v41  ;;  %v1156_v58 = vadd.f32 %v1155_v43, %v3611_v11  ;;  %v2608_v41 = vor.u32 %v2785_v35, %v2605_v38  ;;  %v2804_v43 = vld [vmem:[#allocation3 + $0xb4] sm:$0xf0] }
 0x19f   : > { %v1059_v50 = vpop.f32.mrf.mxu0  ;;  %2052 = vmatpush.bf16.msrb.mxu3 %v2688_v32  ;;  %v2676_v48 = vor.u32 %v2804_v43, %v2675_v42  ;;  %1907 = vmatpush.bf16.msrb.mxu0 %v2604_v37 }
 0x1a0   : > { %v1060_v55 = vadd.f32 %v1059_v50, %v3607_v6  ;;  %v1108_v56 = vpop.f32.mrf.mxu1  ;;  %v1205_v2 = vadd.f32 %v1204_v44, %v1156_v58  ;;  %v2803_v44 = vld [vmem:[#allocation3 + $0xb4] sm:$0xf]  ;;  %v2677_v50 = vld [vmem:[#allocation3 + $0xb8] sm:$0xf0]  ;;  %2005 = vmatpush.bf16.msrb.mxu2 %v2608_v41  ;;  %v2600_v58 = vor.u32 %v2783_v54, %v2597_v57 }
 0x1a1   : > { %v2680_v52 = vor.u32 %v2803_v44, %v2677_v50  ;;  %1955 = vmatpush.bf16.msrb.mxu1 %v2676_v48 }
 0x1a2   : > { %v1109_v59 = vadd.f32 %v1108_v56, %v1060_v55  ;;  %v1239_v19 = vmax.f32 %v1205_v2, 0.0 }
 0x1a3   : > { %2053 = vmatpush.bf16.msrb.mxu3 %v2680_v52  ;;  %1908 = vmatpush.bf16.msrb.mxu0 %v2596_v49 }
 0x1a4   : > { %v1240_v61 = vmax.f32 %v1109_v59, 0.0  ;;  %v2667_v59 = vld [vmem:[#allocation3 + $0xa0] sm:$0xf]  ;;  %2006 = vmatpush.bf16.msrb.mxu2 %v2600_v58 }
 0x1a5   : > { %v1157_v62 = vpop.f32.mrf.mxu2 }
 0x1a6   : > { %v1158_v3 = vadd.f32 %v1157_v62, %v3611_v11  ;;  %v1206_v4 = vpop.f32.mrf.mxu3  ;;  %v1258_v5 = vpack.c.bf16 %v1240_v61, %v1238_v60  ;;  %v2802_v60 = vld [vmem:[#allocation3 + $0xa4] sm:$0xf0] }
 0x1a7   : > { %v1062_v12 = vpop.f32.mrf.mxu0  ;;  %v2668_v63 = vor.u32 %v2802_v60, %v2667_v59 }
 0x1a8   : > { %v1207_v15 = vadd.f32 %v1206_v4, %v1158_v3  ;;  %v1111_v16 = vpop.f32.mrf.mxu1  ;;  %1498 = vmatmul.bf16.gmra.mxu0 %v1258_v5  ;;  %1596 = vmatmul.bf16.gmra.mxu2 %v1258_v5  ;;  %v1063_v26 = vadd.f32 %v1062_v12, %v3607_v6  ;;  %v2587_v3 = vld [vmem:[#allocation3] sm:$0xf]  ;;  %v2782_v4 = vld [vmem:[#allocation3 + $0x4] sm:$0xf0]  ;;  %v2781_v5 = vld [vmem:[#allocation3 + $0x4] sm:$0xf] }
 0x1a9   : > { %v2588_v10 = vor.u32 %v2782_v4, %v2587_v3  ;;  %v2589_v12 = vld [vmem:[#allocation3 + $0x8] sm:$0xf0]  ;;  %1956 = vmatpush.bf16.msrb.mxu1 %v2668_v63 }
 0x1aa   : > { %v1241_v20 = vmax.f32 %v1207_v15, 0.0  ;;  %v1112_v45 = vadd.f32 %v1111_v16, %v1063_v26  ;;  %v2592_v14 = vor.u32 %v2781_v5, %v2589_v12  ;;  %v2659_v15 = vld [vmem:[#allocation3 + $0x90] sm:$0xf]  ;;  %v2800_v16 = vld [vmem:[#allocation3 + $0x94] sm:$0xf0]  ;;  %v2652_v26 = vor.u32 %v2798_v39, %v2651_v23 }
 0x1ab   : > { %1909 = vmatpush.bf16.msrb.mxu0 %v2588_v10 }
 0x1ac   : > { %v1259_v27 = vpack.c.bf16 %v1241_v20, %v1239_v19  ;;  %v1242_v61 = vmax.f32 %v1112_v45, 0.0  ;;  %v2660_v19 = vor.u32 %v2800_v16, %v2659_v15  ;;  %v2661_v20 = vld [vmem:[#allocation3 + $0x98] sm:$0xf0]  ;;  %2007 = vmatpush.bf16.msrb.mxu2 %v2592_v14 }
 0x1ad   : > { %v1160_v31 = vpop.f32.mrf.mxu2  ;;  %v2664_v21 = vor.u32 %v2799_v17, %v2661_v20 }
 0x1ae   : > { %v1209_v36 = vpop.f32.mrf.mxu3  ;;  %1547 = vmatmul.bf16.gmra.mxu1 %v1259_v27  ;;  %1645 = vmatmul.bf16.gmra.mxu3 %v1259_v27  ;;  %v1161_v55 = vadd.f32 %v1160_v31, %v3611_v11  ;;  %v2653_v27 = vld [vmem:[#allocation3 + $0x88] sm:$0xf0]  ;;  %v1294_v31 = vperm.slane %v3647_v30, 2 }
 0x1af   : > { %v1064_v40 = vpop.f32.mrf.mxu0  ;;  %1957 = vmatpush.bf16.msrb.mxu1 %v2660_v19  ;;  %v2656_v28 = vor.u32 %v2797_v24, %v2653_v27 }
 0x1b0   : > { %v1065_v46 = vadd.f32 %v1064_v40, %v3607_v6  ;;  %v1113_v51 = vpop.f32.mrf.mxu1  ;;  %v2801_v6 = vld [vmem:[#allocation3 + $0xa4] sm:$0xf]  ;;  %v1210_v7 = vadd.f32 %v1209_v36, %v1161_v55  ;;  %v3650_v34 = vperm.slane %v1294_v31, 2  ;;  %v1295_v36 = vperm.slane %v3647_v30, 6 }
 0x1b1   : > { %v2672_v2 = vor.u32 %v2801_v6, %v2669_v0 }
 0x1b2   : > { %v1114_v56 = vadd.f32 %v1113_v51, %v1065_v46  ;;  %v1243_v22 = vmax.f32 %v1210_v7, 0.0  ;;  %v3654_v41 = vperm.slane %v1295_v36, 2 }
 0x1b3   : > { %2054 = vmatpush.bf16.msrb.mxu3 %v2672_v2  ;;  %1958 = vmatpush.bf16.msrb.mxu1 %v2652_v26 }
 0x1b4   : > { %v1244_v62 = vmax.f32 %v1114_v56, 0.0 }
 0x1b5   : > { %v1162_v1 = vpop.f32.mrf.mxu2 }
 0x1b6   : > { %v1163_v8 = vadd.f32 %v1162_v1, %v3611_v11  ;;  %v1260_v9 = vpack.c.bf16 %v1244_v62, %v1242_v61  ;;  %v1211_v13 = vpop.f32.mrf.mxu3 }
 0x1b7   : > { %2055 = vmatpush.bf16.msrb.mxu3 %v2664_v21 }
 0x1b8   : > { %v1212_v18 = vadd.f32 %v1211_v13, %v1163_v8  ;;  %1503 = vmatmul.bf16.gmra.mxu0 %v1260_v9  ;;  %1601 = vmatmul.bf16.gmra.mxu2 %v1260_v9 }
 0x1ba   : > { %v1245_v11 = vmax.f32 %v1212_v18, 0.0 }
 0x1bb   : > { %2056 = vmatpush.bf16.msrb.mxu3 %v2656_v28 }
 0x1bc   : > { %v1261_v25 = vpack.c.bf16 %v1245_v11, %v1243_v22 }
 0x1be   : > { %1552 = vmatmul.bf16.gmra.mxu1 %v1261_v25  ;;  %1650 = vmatmul.bf16.gmra.mxu3 %v1261_v25 }
 0x1c5   : > { %v1469_v29 = vpop.f32.mrf.mxu0 }
 0x1c6   : > { %v1470_v37 = vadd.f32 %v1469_v29, %v3650_v34 }
 0x1cb   : > { %v1518_v32 = vpop.f32.mrf.mxu1  ;;  %v1567_v33 = vpop.f32.mrf.mxu2 }
 0x1cc   : > { %v1519_v40 = vadd.f32 %v1518_v32, %v1470_v37  ;;  %v1568_v50 = vadd.f32 %v1567_v33, %v3654_v41 }
 0x1cd   : > { %v1471_v35 = vpop.f32.mrf.mxu0 }
 0x1ce   : > { %v1472_v42 = vadd.f32 %v1471_v35, %v3650_v34  ;;  %v1656_v48 = vmax.f32 %v1519_v40, 0.0 }
 0x1d1   : > { %v1616_v38 = vpop.f32.mrf.mxu3 }
 0x1d2   : > { %v1617_v52 = vadd.f32 %v1616_v38, %v1568_v50 }
 0x1d3   : > { %v1520_v43 = vpop.f32.mrf.mxu1  ;;  %v1569_v44 = vpop.f32.mrf.mxu2 }
 0x1d4   : > { %v1521_v45 = vadd.f32 %v1520_v43, %v1472_v42  ;;  %v1570_v53 = vadd.f32 %v1569_v44, %v3654_v41  ;;  %v1657_v57 = vmax.f32 %v1617_v52, 0.0 }
 0x1d5   : > { %v1474_v46 = vpop.f32.mrf.mxu0 }
 0x1d6   : > { %v1658_v51 = vmax.f32 %v1521_v45, 0.0  ;;  %v1475_v6 = vadd.f32 %v1474_v46, %v3650_v34 }
 0x1d8   : > { %v1688_v47 = vpack.c.bf16 %v1658_v51, %v1656_v48 }
 0x1d9   : > { %v1618_v54 = vpop.f32.mrf.mxu3 }
 0x1da   : > { %v1619_v55 = vadd.f32 %v1618_v54, %v1570_v53  ;;  %1910 = vmatmul.bf16.vlgmr.msrb.gmra.mxu0 %v1688_v47  ;;  %2008 = vmatmul.bf16.vlgmr.msrb.gmra.mxu2 %v1688_v47 }
 0x1db   : > { %v1523_v56 = vpop.f32.mrf.mxu1  ;;  %v1572_v49 = vpop.f32.mrf.mxu2 }
 0x1dc   : > { %v1659_v58 = vmax.f32 %v1619_v55, 0.0  ;;  %v1524_v62 = vadd.f32 %v1523_v56, %v1475_v6  ;;  %v1573_v5 = vadd.f32 %v1572_v49, %v3654_v41 }
 0x1dd   : > { %v1476_v59 = vpop.f32.mrf.mxu0 }
 0x1de   : > { %v1689_v60 = vpack.c.bf16 %v1659_v58, %v1657_v57  ;;  %v1477_v63 = vadd.f32 %v1476_v59, %v3650_v34  ;;  %v1660_v4 = vmax.f32 %v1524_v62, 0.0 }
 0x1e0   : > { %1959 = vmatmul.bf16.vlgmr.msrb.gmra.mxu1 %v1689_v60  ;;  %2057 = vmatmul.bf16.vlgmr.msrb.gmra.mxu3 %v1689_v60 }
 0x1e1   : > { %v1621_v61 = vpop.f32.mrf.mxu3 }
 0x1e2   : > { %v1622_v8 = vadd.f32 %v1621_v61, %v1573_v5 }
 0x1e3   : > { %v1525_v0 = vpop.f32.mrf.mxu1  ;;  %v1574_v1 = vpop.f32.mrf.mxu2 }
 0x1e4   : > { %v1526_v2 = vadd.f32 %v1525_v0, %v1477_v63  ;;  %v1575_v9 = vadd.f32 %v1574_v1, %v3654_v41  ;;  %v1661_v16 = vmax.f32 %v1622_v8, 0.0 }
 0x1e5   : > { %v1479_v3 = vpop.f32.mrf.mxu0 }
 0x1e6   : > { %v1662_v7 = vmax.f32 %v1526_v2, 0.0  ;;  %v1480_v20 = vadd.f32 %v1479_v3, %v3650_v34 }
 0x1e8   : > { %v1690_v10 = vpack.c.bf16 %v1662_v7, %v1660_v4 }
 0x1e9   : > { %v1623_v12 = vpop.f32.mrf.mxu3 }
 0x1ea   : > { %v1624_v13 = vadd.f32 %v1623_v12, %v1575_v9  ;;  %1915 = vmatmul.bf16.gmra.mxu0 %v1690_v10  ;;  %2013 = vmatmul.bf16.gmra.mxu2 %v1690_v10 }
 0x1eb   : > { %v1528_v14 = vpop.f32.mrf.mxu1  ;;  %v1577_v15 = vpop.f32.mrf.mxu2 }
 0x1ec   : > { %v1663_v17 = vmax.f32 %v1624_v13, 0.0  ;;  %v1529_v22 = vadd.f32 %v1528_v14, %v1480_v20  ;;  %v1578_v27 = vadd.f32 %v1577_v15, %v3654_v41 }
 0x1ed   : > { %v1481_v18 = vpop.f32.mrf.mxu0 }
 0x1ee   : > { %v1691_v19 = vpack.c.bf16 %v1663_v17, %v1661_v16  ;;  %v1482_v11 = vadd.f32 %v1481_v18, %v3650_v34  ;;  %v1664_v26 = vmax.f32 %v1529_v22, 0.0 }
 0x1f0   : > { %1964 = vmatmul.bf16.gmra.mxu1 %v1691_v19  ;;  %2062 = vmatmul.bf16.gmra.mxu3 %v1691_v19 }
 0x1f1   : > { %v1626_v21 = vpop.f32.mrf.mxu3 }
 0x1f2   : > { %v1627_v29 = vadd.f32 %v1626_v21, %v1578_v27 }
 0x1f3   : > { %v1530_v23 = vpop.f32.mrf.mxu1  ;;  %v1579_v39 = vpop.f32.mrf.mxu2 }
 0x1f4   : > { %v1531_v24 = vadd.f32 %v1530_v23, %v1482_v11  ;;  %v1580_v31 = vadd.f32 %v1579_v39, %v3654_v41  ;;  %v1665_v38 = vmax.f32 %v1627_v29, 0.0 }
 0x1f5   : > { %v1484_v25 = vpop.f32.mrf.mxu0 }
 0x1f6   : > { %v1666_v28 = vmax.f32 %v1531_v24, 0.0  ;;  %v1485_v44 = vadd.f32 %v1484_v25, %v3650_v34 }
 0x1f8   : > { %v1692_v32 = vpack.c.bf16 %v1666_v28, %v1664_v26 }
 0x1f9   : > { %v1628_v33 = vpop.f32.mrf.mxu3 }
 0x1fa   : > { %v1629_v35 = vadd.f32 %v1628_v33, %v1580_v31  ;;  %1920 = vmatmul.bf16.gmra.mxu0 %v1692_v32  ;;  %2018 = vmatmul.bf16.gmra.mxu2 %v1692_v32 }
 0x1fb   : > { %v1533_v36 = vpop.f32.mrf.mxu1  ;;  %v1582_v37 = vpop.f32.mrf.mxu2 }
 0x1fc   : > { %v1667_v40 = vmax.f32 %v1629_v35, 0.0  ;;  %v1534_v46 = vadd.f32 %v1533_v36, %v1485_v44  ;;  %v1583_v54 = vadd.f32 %v1582_v37, %v3654_v41 }
 0x1fd   : > { %v1486_v42 = vpop.f32.mrf.mxu0 }
 0x1fe   : > { %v1693_v43 = vpack.c.bf16 %v1667_v40, %v1665_v38  ;;  %v1487_v48 = vadd.f32 %v1486_v42, %v3650_v34  ;;  %v1668_v53 = vmax.f32 %v1534_v46, 0.0 }
 0x200   : > { %1969 = vmatmul.bf16.gmra.mxu1 %v1693_v43  ;;  %2067 = vmatmul.bf16.gmra.mxu3 %v1693_v43 }
 0x201   : > { %v1631_v45 = vpop.f32.mrf.mxu3 }
 0x202   : > { %v1632_v56 = vadd.f32 %v1631_v45, %v1583_v54 }
 0x203   : > { %v1535_v50 = vpop.f32.mrf.mxu1  ;;  %v1584_v51 = vpop.f32.mrf.mxu2 }
 0x204   : > { %v1536_v52 = vadd.f32 %v1535_v50, %v1487_v48  ;;  %v1585_v49 = vadd.f32 %v1584_v51, %v3654_v41  ;;  %v1669_v61 = vmax.f32 %v1632_v56, 0.0 }
 0x205   : > { %v1489_v47 = vpop.f32.mrf.mxu0 }
 0x206   : > { %v1670_v55 = vmax.f32 %v1536_v52, 0.0  ;;  %v1490_v1 = vadd.f32 %v1489_v47, %v3650_v34 }
 0x208   : > { %v1694_v57 = vpack.c.bf16 %v1670_v55, %v1668_v53 }
 0x209   : > { %v1633_v58 = vpop.f32.mrf.mxu3 }
 0x20a   : > { %v1634_v59 = vadd.f32 %v1633_v58, %v1585_v49  ;;  %1925 = vmatmul.bf16.gmra.mxu0 %v1694_v57  ;;  %2023 = vmatmul.bf16.gmra.mxu2 %v1694_v57 }
 0x20b   : > { %v1538_v60 = vpop.f32.mrf.mxu1  ;;  %v1587_v6 = vpop.f32.mrf.mxu2 }
 0x20c   : > { %v1671_v62 = vmax.f32 %v1634_v59, 0.0  ;;  %v1539_v3 = vadd.f32 %v1538_v60, %v1490_v1  ;;  %v1588_v12 = vadd.f32 %v1587_v6, %v3654_v41 }
 0x20d   : > { %v1491_v63 = vpop.f32.mrf.mxu0 }
 0x20e   : > { %v1695_v0 = vpack.c.bf16 %v1671_v62, %v1669_v61  ;;  %v1492_v4 = vadd.f32 %v1491_v63, %v3650_v34  ;;  %v1672_v10 = vmax.f32 %v1539_v3, 0.0 }
 0x210   : > { %1974 = vmatmul.bf16.gmra.mxu1 %v1695_v0  ;;  %2072 = vmatmul.bf16.gmra.mxu3 %v1695_v0 }
 0x211   : > { %v1636_v2 = vpop.f32.mrf.mxu3 }
 0x212   : > { %v1637_v14 = vadd.f32 %v1636_v2, %v1588_v12 }
 0x213   : > { %v1540_v5 = vpop.f32.mrf.mxu1  ;;  %v1589_v7 = vpop.f32.mrf.mxu2 }
 0x214   : > { %v1541_v8 = vadd.f32 %v1540_v5, %v1492_v4  ;;  %v1590_v15 = vadd.f32 %v1589_v7, %v3654_v41  ;;  %v1673_v21 = vmax.f32 %v1637_v14, 0.0 }
 0x215   : > { %v1494_v9 = vpop.f32.mrf.mxu0 }
 0x216   : > { %v1674_v13 = vmax.f32 %v1541_v8, 0.0  ;;  %v1495_v39 = vadd.f32 %v1494_v9, %v3650_v34 }
 0x218   : > { %v1696_v16 = vpack.c.bf16 %v1674_v13, %v1672_v10 }
 0x219   : > { %v1638_v17 = vpop.f32.mrf.mxu3 }
 0x21a   : > { %v1639_v18 = vadd.f32 %v1638_v17, %v1590_v15  ;;  %1930 = vmatmul.bf16.gmra.mxu0 %v1696_v16  ;;  %2028 = vmatmul.bf16.gmra.mxu2 %v1696_v16 }
 0x21b   : > { %v1543_v19 = vpop.f32.mrf.mxu1  ;;  %v1592_v20 = vpop.f32.mrf.mxu2 }
 0x21c   : > { %v1675_v22 = vmax.f32 %v1639_v18, 0.0  ;;  %v1544_v25 = vadd.f32 %v1543_v19, %v1495_v39  ;;  %v1593_v33 = vadd.f32 %v1592_v20, %v3654_v41 }
 0x21d   : > { %v1496_v11 = vpop.f32.mrf.mxu0 }
 0x21e   : > { %v1697_v23 = vpack.c.bf16 %v1675_v22, %v1673_v21  ;;  %v1497_v26 = vadd.f32 %v1496_v11, %v3650_v34  ;;  %v1676_v32 = vmax.f32 %v1544_v25, 0.0 }
 0x220   : > { %1979 = vmatmul.bf16.gmra.mxu1 %v1697_v23  ;;  %2077 = vmatmul.bf16.gmra.mxu3 %v1697_v23 }
 0x221   : > { %v1641_v24 = vpop.f32.mrf.mxu3 }
 0x222   : > { %v1642_v36 = vadd.f32 %v1641_v24, %v1593_v33 }
 0x223   : > { %v1545_v27 = vpop.f32.mrf.mxu1  ;;  %v1594_v28 = vpop.f32.mrf.mxu2 }
 0x224   : > { %v1546_v29 = vadd.f32 %v1545_v27, %v1497_v26  ;;  %v1595_v38 = vadd.f32 %v1594_v28, %v3654_v41  ;;  %v1677_v45 = vmax.f32 %v1642_v36, 0.0  ;;  %v1737_v26 = vperm.slane %v3647_v30, 7 }
 0x225   : > { %v1499_v31 = vpop.f32.mrf.mxu0 }
 0x226   : > { %v1678_v35 = vmax.f32 %v1546_v29, 0.0  ;;  %v1500_v51 = vadd.f32 %v1499_v31, %v3650_v34  ;;  %v3692_v31 = vperm.slane %v1737_v26, 3 }
 0x228   : > { %v1698_v37 = vpack.c.bf16 %v1678_v35, %v1676_v32 }
 0x229   : > { %v1643_v40 = vpop.f32.mrf.mxu3 }
 0x22a   : > { %v1644_v42 = vadd.f32 %v1643_v40, %v1595_v38  ;;  %1935 = vmatmul.bf16.gmra.mxu0 %v1698_v37  ;;  %2033 = vmatmul.bf16.gmra.mxu2 %v1698_v37 }
 0x22b   : > { %v1548_v43 = vpop.f32.mrf.mxu1  ;;  %v1597_v44 = vpop.f32.mrf.mxu2 }
 0x22c   : > { %v1679_v46 = vmax.f32 %v1644_v42, 0.0  ;;  %v1549_v47 = vadd.f32 %v1548_v43, %v1500_v51  ;;  %v1598_v58 = vadd.f32 %v1597_v44, %v3654_v41 }
 0x22d   : > { %v1501_v48 = vpop.f32.mrf.mxu0 }
 0x22e   : > { %v1699_v50 = vpack.c.bf16 %v1679_v46, %v1677_v45  ;;  %v1502_v53 = vadd.f32 %v1501_v48, %v3650_v34  ;;  %v1680_v57 = vmax.f32 %v1549_v47, 0.0 }
 0x230   : > { %1984 = vmatmul.bf16.gmra.mxu1 %v1699_v50  ;;  %2082 = vmatmul.bf16.gmra.mxu3 %v1699_v50 }
 0x231   : > { %v1646_v52 = vpop.f32.mrf.mxu3 }
 0x232   : > { %v1647_v60 = vadd.f32 %v1646_v52, %v1598_v58 }
 0x233   : > { %v1550_v54 = vpop.f32.mrf.mxu1  ;;  %v1599_v55 = vpop.f32.mrf.mxu2 }
 0x234   : > { %v1551_v56 = vadd.f32 %v1550_v54, %v1502_v53  ;;  %v1600_v61 = vadd.f32 %v1599_v55, %v3654_v41  ;;  %v1681_v2 = vmax.f32 %v1647_v60, 0.0 }
 0x235   : > { %v1504_v49 = vpop.f32.mrf.mxu0 }
 0x236   : > { %v1682_v59 = vmax.f32 %v1551_v56, 0.0  ;;  %v1505_v7 = vadd.f32 %v1504_v49, %v3650_v34 }
 0x238   : > { %v1700_v6 = vpack.c.bf16 %v1682_v59, %v1680_v57 }
 0x239   : > { %v1648_v62 = vpop.f32.mrf.mxu3 }
 0x23a   : > { %v1649_v63 = vadd.f32 %v1648_v62, %v1600_v61  ;;  %1940 = vmatmul.bf16.gmra.mxu0 %v1700_v6  ;;  %2038 = vmatmul.bf16.gmra.mxu2 %v1700_v6 }
 0x23b   : > { %v1553_v0 = vpop.f32.mrf.mxu1  ;;  %v1602_v1 = vpop.f32.mrf.mxu2 }
 0x23c   : > { %v1683_v3 = vmax.f32 %v1649_v63, 0.0  ;;  %v1554_v9 = vadd.f32 %v1553_v0, %v1505_v7  ;;  %v1603_v16 = vadd.f32 %v1602_v1, %v3654_v41 }
 0x23d   : > { %v1506_v5 = vpop.f32.mrf.mxu0 }
 0x23e   : > { %v1701_v4 = vpack.c.bf16 %v1683_v3, %v1681_v2  ;;  %v1507_v10 = vadd.f32 %v1506_v5, %v3650_v34  ;;  %v1684_v15 = vmax.f32 %v1554_v9, 0.0  ;;  %v1736_v34 = vperm.slane %v3647_v30, 3 }
 0x240   : > { %1989 = vmatmul.bf16.gmra.mxu1 %v1701_v4  ;;  %2087 = vmatmul.bf16.gmra.mxu3 %v1701_v4  ;;  %v3688_v25 = vperm.slane %v1736_v34, 3 }
 0x241   : > { %v1651_v8 = vpop.f32.mrf.mxu3 }
 0x242   : > { %v1652_v18 = vadd.f32 %v1651_v8, %v1603_v16 }
 0x243   : > { %v1555_v12 = vpop.f32.mrf.mxu1  ;;  %v1604_v14 = vpop.f32.mrf.mxu2 }
 0x244   : > { %v1556_v13 = vadd.f32 %v1555_v12, %v1507_v10  ;;  %v1605_v20 = vadd.f32 %v1604_v14, %v3654_v41  ;;  %v1685_v11 = vmax.f32 %v1652_v18, 0.0 }
 0x246   : > { %v1686_v17 = vmax.f32 %v1556_v13, 0.0 }
 0x248   : > { %v1702_v19 = vpack.c.bf16 %v1686_v17, %v1684_v15 }
 0x249   : > { %v1653_v21 = vpop.f32.mrf.mxu3 }
 0x24a   : > { %v1654_v22 = vadd.f32 %v1653_v21, %v1605_v20  ;;  %1945 = vmatmul.bf16.gmra.mxu0 %v1702_v19  ;;  %2043 = vmatmul.bf16.gmra.mxu2 %v1702_v19 }
 0x24c   : > { %v1687_v23 = vmax.f32 %v1654_v22, 0.0 }
 0x24e   : > { %v1703_v39 = vpack.c.bf16 %v1687_v23, %v1685_v11 }
 0x250   : > { %1994 = vmatmul.bf16.gmra.mxu1 %v1703_v39  ;;  %2092 = vmatmul.bf16.gmra.mxu3 %v1703_v39 }
 0x257   : > { %v1911_v24 = vpop.f32.mrf.mxu0 }
 0x258   : > { %v1912_v27 = vadd.f32 %v1911_v24, %v3688_v25 }
 0x25d   : > { %v1960_v28 = vpop.f32.mrf.mxu1  ;;  %v2009_v41 = vpop.f32.mrf.mxu2 }
 0x25e   : > { %v1961_v29 = vadd.f32 %v1960_v28, %v1912_v27  ;;  %v2010_v33 = vadd.f32 %v2009_v41, %v3692_v31 }
 0x25f   : > { %v1913_v32 = vpop.f32.mrf.mxu0 }
 0x260   : > { %v1914_v36 = vadd.f32 %v1913_v32, %v3688_v25  ;;  %v2098_v44 = vmax.f32 %v1961_v29, 0.0 }
 0x263   : > { %v2058_v35 = vpop.f32.mrf.mxu3 }
 0x264   : > { %v2059_v37 = vadd.f32 %v2058_v35, %v2010_v33 }
 0x265   : > { %v1962_v38 = vpop.f32.mrf.mxu1  ;;  %v2011_v40 = vpop.f32.mrf.mxu2 }
 0x266   : > { %v1963_v42 = vadd.f32 %v1962_v38, %v1914_v36  ;;  %v2012_v46 = vadd.f32 %v2011_v40, %v3692_v31  ;;  %v2099_v53 = vmax.f32 %v2059_v37, 0.0 }
 0x267   : > { %v1916_v43 = vpop.f32.mrf.mxu0 }
 0x268   : > { %v2100_v30 = vmax.f32 %v1963_v42, 0.0  ;;  %v1917_v50 = vadd.f32 %v1916_v43, %v3688_v25 }
 0x26a   : > { %v3696_v45 = vpack.c.bf16 %v2100_v30, %v2098_v44 }
 0x26b   : > { %v2060_v48 = vpop.f32.mrf.mxu3 }
 0x26c   : > { %v2061_v51 = vadd.f32 %v2060_v48, %v2012_v46 }
 0x26d   : > { %v1965_v52 = vpop.f32.mrf.mxu1  ;;  %v2014_v47 = vpop.f32.mrf.mxu2 }
 0x26e   : > { %v2101_v54 = vmax.f32 %v2061_v51, 0.0  ;;  %v1966_v55 = vadd.f32 %v1965_v52, %v1917_v50  ;;  %v2015_v57 = vadd.f32 %v2014_v47, %v3692_v31 }
 0x26f   : > { %v1918_v56 = vpop.f32.mrf.mxu0 }
 0x270   : > { %v3700_v49 = vpack.c.bf16 %v2101_v54, %v2099_v53  ;;  %v1919_v59 = vadd.f32 %v1918_v56, %v3688_v25  ;;  %v2102_v0 = vmax.f32 %v1966_v55, 0.0 }
 0x273   : > { %v2063_v58 = vpop.f32.mrf.mxu3 }
 0x274   : > { %v2064_v60 = vadd.f32 %v2063_v58, %v2015_v57 }
 0x275   : > { %v1967_v6 = vpop.f32.mrf.mxu1  ;;  %v2016_v61 = vpop.f32.mrf.mxu2 }
 0x276   : > { %v1968_v62 = vadd.f32 %v1967_v6, %v1919_v59  ;;  %v2017_v3 = vadd.f32 %v2016_v61, %v3692_v31  ;;  %v2103_v10 = vmax.f32 %v2064_v60, 0.0 }
 0x277   : > { %v1921_v63 = vpop.f32.mrf.mxu0 }
 0x278   : > { %v2104_v1 = vmax.f32 %v1968_v62, 0.0  ;;  %v1922_v5 = vadd.f32 %v1921_v63, %v3688_v25 }
 0x27a   : > { %v3704_v2 = vpack.c.bf16 %v2104_v1, %v2102_v0 }
 0x27b   : > { %v2065_v4 = vpop.f32.mrf.mxu3 }
 0x27c   : > { %v2066_v7 = vadd.f32 %v2065_v4, %v2017_v3 }
 0x27d   : > { %v1970_v8 = vpop.f32.mrf.mxu1  ;;  %v2019_v9 = vpop.f32.mrf.mxu2 }
 0x27e   : > { %v2105_v12 = vmax.f32 %v2066_v7, 0.0  ;;  %v1971_v13 = vadd.f32 %v1970_v8, %v1922_v5  ;;  %v2020_v16 = vadd.f32 %v2019_v9, %v3692_v31 }
 0x27f   : > { %v1923_v14 = vpop.f32.mrf.mxu0 }
 0x280   : > { %v3708_v15 = vpack.c.bf16 %v2105_v12, %v2103_v10  ;;  %v1924_v18 = vadd.f32 %v1923_v14, %v3688_v25  ;;  %v2106_v23 = vmax.f32 %v1971_v13, 0.0 }
 0x283   : > { %v2068_v17 = vpop.f32.mrf.mxu3 }
 0x284   : > { %v2069_v19 = vadd.f32 %v2068_v17, %v2020_v16 }
 0x285   : > { %v1972_v20 = vpop.f32.mrf.mxu1  ;;  %v2021_v21 = vpop.f32.mrf.mxu2 }
 0x286   : > { %v1973_v22 = vadd.f32 %v1972_v20, %v1924_v18  ;;  %v2022_v24 = vadd.f32 %v2021_v21, %v3692_v31  ;;  %v2107_v32 = vmax.f32 %v2069_v19, 0.0 }
 0x287   : > { %v1926_v11 = vpop.f32.mrf.mxu0 }
 0x288   : > { %v2108_v39 = vmax.f32 %v1973_v22, 0.0  ;;  %v1927_v27 = vadd.f32 %v1926_v11, %v3688_v25 }
 0x28a   : > { %v3712_v34 = vpack.c.bf16 %v2108_v39, %v2106_v23 }
 0x28b   : > { %v2070_v26 = vpop.f32.mrf.mxu3 }
 0x28c   : > { %v2071_v28 = vadd.f32 %v2070_v26, %v2022_v24 }
 0x28d   : > { %v1975_v41 = vpop.f32.mrf.mxu1  ;;  %v2024_v29 = vpop.f32.mrf.mxu2 }
 0x28e   : > { %v2109_v33 = vmax.f32 %v2071_v28, 0.0  ;;  %v1976_v35 = vadd.f32 %v1975_v41, %v1927_v27  ;;  %v2025_v38 = vadd.f32 %v2024_v29, %v3692_v31 }
 0x28f   : > { %v1928_v36 = vpop.f32.mrf.mxu0 }
 0x290   : > { %v3716_v37 = vpack.c.bf16 %v2109_v33, %v2107_v32  ;;  %v1929_v42 = vadd.f32 %v1928_v36, %v3688_v25  ;;  %v2110_v50 = vmax.f32 %v1976_v35, 0.0 }
 0x293   : > { %v2073_v40 = vpop.f32.mrf.mxu3 }
 0x294   : > { %v2074_v43 = vadd.f32 %v2073_v40, %v2025_v38 }
 0x295   : > { %v1977_v44 = vpop.f32.mrf.mxu1  ;;  %v2026_v30 = vpop.f32.mrf.mxu2 }
 0x296   : > { %v1978_v46 = vadd.f32 %v1977_v44, %v1929_v42  ;;  %v2027_v47 = vadd.f32 %v2026_v30, %v3692_v31  ;;  %v2111_v58 = vmax.f32 %v2074_v43, 0.0 }
 0x297   : > { %v1931_v48 = vpop.f32.mrf.mxu0 }
 0x298   : > { %v2112_v51 = vmax.f32 %v1978_v46, 0.0  ;;  %v1932_v54 = vadd.f32 %v1931_v48, %v3688_v25 }
 0x29a   : > { %v3720_v52 = vpack.c.bf16 %v2112_v51, %v2110_v50 }
 0x29b   : > { %v2075_v53 = vpop.f32.mrf.mxu3 }
 0x29c   : > { %v2076_v55 = vadd.f32 %v2075_v53, %v2027_v47 }
 0x29d   : > { %v1980_v56 = vpop.f32.mrf.mxu1  ;;  %v2029_v57 = vpop.f32.mrf.mxu2 }
 0x29e   : > { %v2113_v59 = vmax.f32 %v2076_v55, 0.0  ;;  %v1981_v60 = vadd.f32 %v1980_v56, %v1932_v54  ;;  %v2030_v62 = vadd.f32 %v2029_v57, %v3692_v31 }
 0x29f   : > { %v1933_v6 = vpop.f32.mrf.mxu0 }
 0x2a0   : > { %v3724_v61 = vpack.c.bf16 %v2113_v59, %v2111_v58  ;;  %v1934_v0 = vadd.f32 %v1933_v6, %v3688_v25  ;;  %v2114_v8 = vmax.f32 %v1981_v60, 0.0 }
 0x2a3   : > { %v2078_v63 = vpop.f32.mrf.mxu3 }
 0x2a4   : > { %v2079_v1 = vadd.f32 %v2078_v63, %v2030_v62 }
 0x2a5   : > { %v1982_v3 = vpop.f32.mrf.mxu1  ;;  %v2031_v4 = vpop.f32.mrf.mxu2 }
 0x2a6   : > { %v1983_v5 = vadd.f32 %v1982_v3, %v1934_v0  ;;  %v2032_v12 = vadd.f32 %v2031_v4, %v3692_v31  ;;  %v2115_v18 = vmax.f32 %v2079_v1, 0.0 }
 0x2a7   : > { %v1936_v7 = vpop.f32.mrf.mxu0 }
 0x2a8   : > { %v2116_v9 = vmax.f32 %v1983_v5, 0.0 }
 0x2aa   : > { %v3728_v10 = vpack.c.bf16 %v2116_v9, %v2114_v8 }
 0x2ab   : > { %v2080_v13 = vpop.f32.mrf.mxu3 }
 0x2ac   : > { %v2081_v14 = vadd.f32 %v2080_v13, %v2032_v12  ;;  %v1937_v13 = vadd.f32 %v1936_v7, %v3688_v25 }
 0x2ad   : > { %v1985_v16 = vpop.f32.mrf.mxu1  ;;  %v2034_v17 = vpop.f32.mrf.mxu2 }
 0x2ae   : > { %v2117_v19 = vmax.f32 %v2081_v14, 0.0 }
 0x2af   : > { %v1938_v20 = vpop.f32.mrf.mxu0 }
 0x2b0   : > { %v3731_v21 = vpack.c.bf16 %v2117_v19, %v2115_v18  ;;  %v1939_v4 = vadd.f32 %v1938_v20, %v3688_v25  ;;  %v2035_v20 = vadd.f32 %v2034_v17, %v3692_v31  ;;  %v2969_v17 = vmov 0  }
 0x2b1   : > { %2866 = vset.pattern.permute.xlu0 %v2969_v17 }
 0x2b3   : > { %v2083_v22 = vpop.f32.mrf.mxu3 }
 0x2b5   : > { %v1987_v11 = vpop.f32.mrf.mxu1  ;;  %v2036_v23 = vpop.f32.mrf.mxu2 }
 0x2b6   : > { %v1988_v14 = vadd.f32 %v1987_v11, %v1939_v4 }
 0x2b7   : > { %v1941_v39 = vpop.f32.mrf.mxu0 }
 0x2b8   : > { %v1942_v55 = vadd.f32 %v1941_v39, %v3688_v25  ;;  %v1986_v39 = vadd.f32 %v1985_v16, %v1937_v13  ;;  %v2146_v16 = vld [vmem:[%s3798_s8] sm:$0x3] }
 0x2b9   : > { %2155 = vst [vmem:[#allocation1] ss:$9 sm:$0xff] %v2146_v16 }
 0x2bb   : > { %v2085_v24 = vpop.f32.mrf.mxu3 }
 0x2bd   : > { %v1990_v26 = vpop.f32.mrf.mxu1  ;;  %v2039_v27 = vpop.f32.mrf.mxu2 }
 0x2be   : > { %v1991_v6 = vadd.f32 %v1990_v26, %v1942_v55  ;;  %v2040_v8 = vadd.f32 %v2039_v27, %v3692_v31 }
 0x2bf   : > { %v1943_v28 = vpop.f32.mrf.mxu0 }
 0x2c0   : > { %v1944_v51 = vadd.f32 %v1943_v28, %v3688_v25  ;;  %v2122_v5 = vmax.f32 %v1991_v6, 0.0  ;;  %v2120_v28 = vmax.f32 %v1988_v14, 0.0 }
 0x2c3   : > { %v2088_v41 = vpop.f32.mrf.mxu3 }
 0x2c4   : > { %v2089_v18 = vadd.f32 %v2088_v41, %v2040_v8 }
 0x2c5   : > { %v1992_v29 = vpop.f32.mrf.mxu1  ;;  %v2041_v32 = vpop.f32.mrf.mxu2 }
 0x2c6   : > { %v1993_v56 = vadd.f32 %v1992_v29, %v1944_v51  ;;  %v2042_v0 = vadd.f32 %v2041_v32, %v3692_v31  ;;  %v2037_v29 = vadd.f32 %v2036_v23, %v3692_v31  ;;  %v2123_v32 = vmax.f32 %v2089_v18, 0.0 }
 0x2c7   : > { %v1946_v33 = vpop.f32.mrf.mxu0 }
 0x2c8   : > { %v1947_v42 = vadd.f32 %v1946_v33, %v3688_v25  ;;  %v2124_v63 = vmax.f32 %v1993_v56, 0.0  ;;  %v2118_v33 = vmax.f32 %v1986_v39, 0.0 }
 0x2ca   : > { %v2142_v19 = vpack.c.bf16 %v2124_v63, %v2122_v5 }
 0x2cb   : > { %v2090_v35 = vpop.f32.mrf.mxu3 }
 0x2cc   : > { %v2091_v9 = vadd.f32 %v2090_v35, %v2042_v0  ;;  %v2084_v35 = vadd.f32 %v2083_v22, %v2035_v20 }
 0x2cd   : > { %v1995_v36 = vpop.f32.mrf.mxu1  ;;  %v2044_v38 = vpop.f32.mrf.mxu2 }
 0x2ce   : > { %v1996_v44 = vadd.f32 %v1995_v36, %v1947_v42  ;;  %v2045_v53 = vadd.f32 %v2044_v38, %v3692_v31  ;;  %v2125_v26 = vmax.f32 %v2091_v9, 0.0  ;;  %v2086_v36 = vadd.f32 %v2085_v24, %v2037_v29 }
 0x2cf   : > { %v1948_v40 = vpop.f32.mrf.mxu0  ;;  %v2140_v38 = vpack.c.bf16 %v2120_v28, %v2118_v33  ;;  %v2119_v7 = vmax.f32 %v2084_v35, 0.0 }
 0x2d0   : > { %v1949_v30 = vadd.f32 %v1948_v40, %v3688_v25  ;;  %v2126_v47 = vmax.f32 %v1996_v44, 0.0  ;;  %v2143_v27 = vpack.c.bf16 %v2125_v26, %v2123_v32  ;;  %v2121_v25 = vmax.f32 %v2086_v36, 0.0 }
 0x2d2   : > { %v2141_v11 = vpack.c.bf16 %v2121_v25, %v2119_v7 }
 0x2d3   : > { %v2093_v43 = vpop.f32.mrf.mxu3 }
 0x2d4   : > { %v2094_v57 = vadd.f32 %v2093_v43, %v2045_v53 }
 0x2d5   : > { %v1997_v46 = vpop.f32.mrf.mxu1  ;;  %v2046_v50 = vpop.f32.mrf.mxu2 }
 0x2d6   : > { %v1998_v48 = vadd.f32 %v1997_v46, %v1949_v30  ;;  %v2047_v59 = vadd.f32 %v2046_v50, %v3692_v31  ;;  %v2127_v1 = vmax.f32 %v2094_v57, 0.0  ;;  %v2147_v31 = vld [vmem:[#allocation2] sm:$0x1] }
 0x2d7   : > { %2150 = vperm.xlu0 %2866, %v2147_v31  }
 0x2d8   : > { %v2128_v54 = vmax.f32 %v1998_v48, 0.0 }
 0x2da   : > { %v2144_v58 = vpack.c.bf16 %v2128_v54, %v2126_v47 }
 0x2db   : > { %v2095_v60 = vpop.f32.mrf.mxu3 }
 0x2dc   : > { %v2096_v62 = vadd.f32 %v2095_v60, %v2047_v59  ;;  %2160 = vmatpush.bf16.xpose.msra.mxu0 %v2144_v58 }
 0x2de   : > { %v2129_v3 = vmax.f32 %v2096_v62, 0.0 }
 0x2e0   : > { %v2145_v12 = vpack.c.bf16 %v2129_v3, %v2127_v1 }
 0x2e2   : > { %2173 = vmatpush.bf16.xpose.msra.mxu1 %v2145_v12 }
 0x2e4   : > { %2161 = vmatpush.bf16.xpose.msra.mxu0 %v2142_v19 }
 0x2ea   : > { %2174 = vmatpush.bf16.xpose.msra.mxu1 %v2143_v27 }
 0x2ec   : > { %2162 = vmatpush.bf16.xpose.msra.mxu0 %v2140_v38 }
 0x2f2   : > { %2175 = vmatpush.bf16.xpose.msra.mxu1 %v2141_v11 }
 0x2f4   : > { %2163 = vmatpush.bf16.xpose.msra.mxu0 %v3728_v10  ;;  %v2156_v10 = vld [vmem:[#allocation1] sm:$0xff] }
 0x2fa   : > { %2176 = vmatpush.bf16.xpose.msra.mxu1 %v3731_v21 }
 0x2fc   : > { %2164 = vmatpush.bf16.xpose.msra.mxu0 %v3720_v52  ;;  %v2157_v52 = vld [vmem:[#allocation1 + $0x9] sm:$0xff] }
 0x302   : > { %2177 = vmatpush.bf16.xpose.msra.mxu1 %v3724_v61 }
 0x304   : > { %2165 = vmatpush.bf16.xpose.msra.mxu0 %v3712_v34 }
 0x30a   : > { %2178 = vmatpush.bf16.xpose.msra.mxu1 %v3716_v37 }
 0x30c   : > { %2166 = vmatpush.bf16.xpose.msra.mxu0 %v3704_v2 }
 0x312   : > { %2179 = vmatpush.bf16.xpose.msra.mxu1 %v3708_v15 }
 0x314   : > { %2167 = vmatpush.bf16.xpose.msra.mxu0 %v3696_v45 }
 0x31a   : > { %2180 = vmatpush.bf16.xpose.msra.mxu1 %v3700_v49 }
 0x31b   : > { %2168 = vmatmul.bf16.vlgmr.msra.gmra.mxu0 %v2156_v10 }
 0x321   : > { %2181 = vmatmul.bf16.vlgmr.msra.gmra.mxu1 %v2157_v52 }
 0x349   : > { %v2151_v61 = vpop.permute.xlu0 %2150 }
 0x34a   : > { %v2153_v21 = vperm.slane %v2151_v61, 0 }
 0x398   : > { %v2169_v22 = vpop.f32.mrf.mxu0 }
 0x399   : > { %v2170_v2 = vadd.f32 %v2169_v22, %v2153_v21 }
 0x39e   : > { %v2182_v45 = vpop.f32.mrf.mxu1 }
 0x39f   : > { %v2183_v15 = vadd.f32 %v2182_v45, %v2170_v2 }
 0x3a0   : > { %v2171_v49 = vpop.f32.mrf.mxu0 }
 0x3a1   : > { %2186 = vst [vmem:[%s387_s21] sm:$0x1] %v2183_v15 }
 0x3a2   : > { %2925 = shalt.err (!%p2922_p8)
}
 0x3a3   : > { %2817 = dma.vmem_to_hbm [thread:$0]  (%p3066_p5), %s2199_s22, 16, %s2201_s30, %s2188_s26  }
 0x3a6   : > { %v2184_v34 = vpop.f32.mrf.mxu1 }
 0x3a7 PF: > { %p2829_p9 = scmp.ge.s32.totalorder %s2964_s18, 2  ;;  %s2212_s12 = sand.u32 1, %s2952_s15  }
 0x3a8   : > { %s2213_s19 = scalar_lea.sflag [#allocation5], %s2212_s12 }
 0x3a9   : > { %p2824_p10 = pnand %p2829_p9, %p3070_p6 }
 0x3ab   : > { %p2825_p11 = pneg %p2824_p10 }
 0x3ad   : > { %2947 = dma.done.wait (%p2825_p11), %s2213_s19, 16  }
 0x3ae   : > { %2949 = vsyncadd (%p2825_p11), %s2213_s19, 4294967280  ;;  %p23_p12 = scmp.ge.s32.totalorder %s3053_s20, 4   ;;  %s3803_s15 = smov %s2956_s16 }
 0x3af   : > { %s3804_s16 = smov %s2960_s17  ;;  %s3805_s17 = smov %s3064_s23 }
 0x3b0   : > { %s3806_s18 = smov %s3053_s20  ;;  %25 = sbr.rel (!%p23_p12) target bundleno = 7 (0x7), region = 103 }
 0x3b5   :  { %2218 = vsyncpa [#allocation4], 1 }
 0x3b6   :  { %2220 = vsyncpa [#allocation4 + $0x1], 1 }
 0x3b7   :  { %2221 = vsyncpa [#allocation5], 1 }
 0x3b8   :  { %2223 = vsyncpa [#allocation5 + $0x1], 1 }

</bundles_post_ra>
